<compile_context>
chip_gen: v6e
topology: v6e:2x2x1
jax: 0.10.0
libtpu: 0.0.40
codegen_flags: <defaults>
</compile_context>

<pallas_src>
import functools
import math

import jax
import jax.numpy as jnp
import numpy as np
from jax import lax
from jax.experimental import pallas as pl
from jax.experimental.pallas import tpu as pltpu


# ---------------------------------------------------------------------------
# Kernel
# ---------------------------------------------------------------------------
def _cross_attn_kernel(y_ref, x_ref, wq_ref, bq_ref, wkv_ref, bkv_ref, o_ref,
                       *, scale, use_bf16):
    tb, ny, c = y_ref.shape
    _, nx, _ = x_ref.shape
    ch_pad = wq_ref.shape[1]          # q/k width padded to a 128-lane multiple

    mm = jnp.bfloat16 if use_bf16 else jnp.float32

    # --- projections --------------------------------------------------------
    # Leading-dim flatten only: (tb, n, c) -> (tb*n, c). With n a multiple of
    # the 8-sublane tile this is a layout no-op (no VMEM copy); it turns each
    # projection into one large-M MXU matmul.
    y2 = y_ref[...].reshape(tb * ny, c)
    x2 = x_ref[...].reshape(tb * nx, c)

    q = jnp.dot(y2.astype(mm), wq_ref[...].astype(mm),
                preferred_element_type=jnp.float32) + bq_ref[...]     # (tb*ny, ch_pad)
    kv = jnp.dot(x2.astype(mm), wkv_ref[...].astype(mm),
                 preferred_element_type=jnp.float32) + bkv_ref[...]   # (tb*nx, ch_pad + c)

    q = q.reshape(tb, ny, ch_pad)
    # Both slices start at 128-aligned lane offsets (0 and ch_pad).
    k = kv[:, :ch_pad].reshape(tb, nx, ch_pad)
    v = kv[:, ch_pad:].reshape(tb, nx, c)

    # --- F.normalize(., p=2, dim=1): per batch element, along the sequence axis.
    # x / max(||x||, eps)  ==  x * rsqrt(max(sum(x^2), eps^2))  (sqrt monotone).
    # The attention scale is folded into q. Padded channels are exact zeros and
    # stay zero (0 * rsqrt(eps^2) == 0), contributing nothing to q.k.
    eps_sq = jnp.float32(1e-24)
    q = q * (jnp.float32(scale) *
             lax.rsqrt(jnp.maximum(jnp.sum(q * q, axis=1, keepdims=True), eps_sq)))
    k = k * lax.rsqrt(jnp.maximum(jnp.sum(k * k, axis=1, keepdims=True), eps_sq))

    # --- attention -----------------------------------------------------------
    # Batched q @ k^T without materializing a transpose of k (MXU-native).
    dots = lax.dot_general(q.astype(mm), k.astype(mm),
                           (((2,), (2,)), ((0,), (0,))),
                           preferred_element_type=jnp.float32)        # (tb, ny, nx)
    dots = dots - jnp.max(dots, axis=-1, keepdims=True)
    e = jnp.exp(dots)
    attn = e * pl.reciprocal(jnp.sum(e, axis=-1, keepdims=True), approx=True)

    out = lax.dot_general(attn.astype(mm), v.astype(mm),
                          (((2,), (1,)), ((0,), (0,))),
                          preferred_element_type=jnp.float32)         # (tb, ny, c)
    o_ref[...] = out.astype(o_ref.dtype)


# ---------------------------------------------------------------------------
# Block-size selection (generation & VMEM aware)
# ---------------------------------------------------------------------------
def _rup(x, m):
    return ((x + m - 1) // m) * m


def _tile_bytes(rows, cols, itemsize=4):
    """Bytes a (rows, cols) f32 buffer occupies in (8, 128)-tiled VMEM."""
    return _rup(max(rows, 1), 8) * _rup(max(cols, 1), 128) * itemsize


def _step_vmem_bytes(bb, ny, nx, c, ch_pad):
    """Rough per-grid-step VMEM footprint for block_b = bb."""
    # Double-buffered y / x / out tiles (pipeline), per leading batch index.
    io = 2 * bb * (2 * _tile_bytes(ny, c) + _tile_bytes(nx, c))
    # Single-buffered constant weights / biases.
    w = (_tile_bytes(c, ch_pad) + _tile_bytes(1, ch_pad)
         + _tile_bytes(c, ch_pad + c) + _tile_bytes(1, ch_pad + c))
    # Live f32 intermediates: q, kv, k, v, dots/attn, out.
    live = (_tile_bytes(bb * ny, ch_pad) + _tile_bytes(bb * nx, ch_pad + c)
            + _tile_bytes(bb * nx, ch_pad) + _tile_bytes(bb * nx, c)
            + 2 * bb * _tile_bytes(ny, nx) + bb * _tile_bytes(ny, c))
    return io + w + 2 * live          # 2x fudge for compiler temporaries


def _tpu_params():
    """(tensorcores_per_chip, vmem_capacity_bytes) for the attached TPU."""
    kind = ""
    try:
        dev = jax.devices()[0]
        if dev.platform == "tpu":
            kind = dev.device_kind.lower().replace(" ", "")
    except Exception:
        pass
    is_v7 = ("v7" in kind) or ("tpu7" in kind)
    num_tc = 2 if is_v7 else 1                 # v5e / v6e have a single TensorCore
    vmem_capacity = (64 if is_v7 else 128) << 20
    return num_tc, vmem_capacity


def _choose_block_b(B, ny, nx, c, ch_pad, *, num_tc, vmem_budget):
    """Largest divisor of B whose per-step footprint fits the VMEM budget.

    On multi-TC chips (v7x) additionally keep >= num_tc grid steps so the
    'parallel' grid axis gives every TensorCore work; on single-TC v5e/v6e the
    grid is a serial loop, so one big step is preferred.
    """
    divisors = [d for d in range(1, B + 1) if B % d == 0]
    fitting = [d for d in divisors
               if _step_vmem_bytes(d, ny, nx, c, ch_pad) <= vmem_budget] or [1]
    if num_tc > 1:
        multi = [d for d in fitting if B // d >= num_tc]
        if multi:
            return max(multi)
    return max(fitting)


# ---------------------------------------------------------------------------
# Wrapper
# ---------------------------------------------------------------------------
def cross_attn(y, x, wq, bq, wk, bk, wv, bv, *, block_b=None, use_bf16=True):
    """Pallas TPU forward of CrossAttn.

    use_bf16=True (default) feeds the MXU bf16 operands with f32 accumulation;
    normalization and softmax stay in f32. This is the recommended path on all
    of v5e / v6e / v7x (the MXU is bf16-native on every generation).
    use_bf16=False keeps f32 MXU operands for closer parity with the module.
    """
    B, Ny, C = y.shape
    _, Nx, Cx = x.shape
    assert Cx == C
    Ch = C // 2
    scale = Ch ** (-0.5)
    ch_pad = _rup(Ch, 128)     # lane-align the q/k width and the kv split point

    num_tc, vmem_cap = _tpu_params()
    if block_b is None:
        block_b = _choose_block_b(B, Ny, Nx, C, ch_pad, num_tc=num_tc,
                                  vmem_budget=int(0.40 * vmem_cap))
    assert B % block_b == 0, "block_b must divide the batch size"
    vmem_limit = int(0.75 * vmem_cap)

    # Layout plumbing (outside the kernel; once per call):
    #   * weights transposed to (in, out) so the MXU consumes them directly,
    #   * Wk / Wv fused into one matmul, with the K section zero-padded to a
    #     128-lane multiple so both kv slices are 128-aligned,
    #   * q projection padded identically (so q.k contracts over ch_pad),
    #   * biases as lane-major (1, D) rows.
    wdt = y.dtype
    wq_t = jnp.zeros((C, ch_pad), wdt).at[:, :Ch].set(wq.T.astype(wdt))
    bq_p = jnp.zeros((1, ch_pad), wdt).at[:, :Ch].set(bq.reshape(1, Ch).astype(wdt))
    wkv_t = jnp.concatenate(
        [jnp.zeros((C, ch_pad), wdt).at[:, :Ch].set(wk.T.astype(wdt)),
         wv.T.astype(wdt)], axis=1)                                  # (C, ch_pad + C)
    bkv_p = jnp.concatenate(
        [jnp.zeros((1, ch_pad), wdt).at[:, :Ch].set(bk.reshape(1, Ch).astype(wdt)),
         bv.reshape(1, C).astype(wdt)], axis=1)                      # (1, ch_pad + C)

    kernel = functools.partial(_cross_attn_kernel, scale=scale, use_bf16=use_bf16)
    grid = (B // block_b,)

    flops = 2 * B * (Ny * C * Ch + Nx * C * (Ch + C) + Ny * Nx * Ch + Ny * Nx * C)
    bytes_accessed = 4 * (2 * B * Ny * C + B * Nx * C
                          + C * ch_pad + ch_pad + C * (ch_pad + C) + (ch_pad + C))
    cost = pl.CostEstimate(flops=flops, transcendentals=B * Ny * Nx,
                           bytes_accessed=bytes_accessed)

    def build(single_buffer_weights):
        # Constant operands: their index_map never changes, so one VMEM buffer
        # is enough (saves VMEM, especially under v7x's 64 MiB ceiling).
        wkw = dict(pipeline_mode=pl.Buffered(1)) if single_buffer_weights else {}
        in_specs = [
            pl.BlockSpec((block_b, Ny, C), lambda b: (b, 0, 0)),          # y tile
            pl.BlockSpec((block_b, Nx, C), lambda b: (b, 0, 0)),          # x tile
            pl.BlockSpec((C, ch_pad), lambda b: (0, 0), **wkw),           # Wq.T (padded)
            pl.BlockSpec((1, ch_pad), lambda b: (0, 0), **wkw),           # bq (padded)
            pl.BlockSpec((C, ch_pad + C), lambda b: (0, 0), **wkw),       # [Wk.T pad | Wv.T]
            pl.BlockSpec((1, ch_pad + C), lambda b: (0, 0), **wkw),       # [bk pad | bv]
        ]
        return pl.pallas_call(
            kernel,
            out_shape=jax.ShapeDtypeStruct((B, Ny, C), y.dtype),
            grid=grid,
            in_specs=in_specs,
            out_specs=pl.BlockSpec((block_b, Ny, C), lambda b: (b, 0, 0)),
            compiler_params=pltpu.CompilerParams(
                dimension_semantics=("parallel",),
                vmem_limit_bytes=vmem_limit),
            cost_estimate=cost,
        )

    args = (y, x, wq_t, bq_p, wkv_t, bkv_p)
    try:
        return build(True)(*args)
    except Exception:
        # Fallback for jax versions that reject single-buffer pipeline_mode:
        # identical kernel with default double-buffered weight blocks.
        return build(False)(*args)


# ---------------------------------------------------------------------------
# Pure-JAX reference (mirrors the PyTorch forward exactly)
# ---------------------------------------------------------------------------
def cross_attn_ref(y, x, wq, bq, wk, bk, wv, bv):
    C = y.shape[-1]
    Ch = C // 2
    scale = Ch ** (-0.5)
    q = jnp.einsum("bnc,dc->bnd", y, wq) + bq
    k = jnp.einsum("bnc,dc->bnd", x, wk) + bk
    v = jnp.einsum("bnc,dc->bnd", x, wv) + bv
    eps = 1e-12
    q = q / jnp.maximum(jnp.linalg.norm(q, axis=1, keepdims=True), eps)
    k = k / jnp.maximum(jnp.linalg.norm(k, axis=1, keepdims=True), eps)
    dots = jnp.einsum("bnd,bmd->bnm", q, k) * scale
    attn = jax.nn.softmax(dots, axis=-1)
    return jnp.einsum("bnm,bmc->bnc", attn, v)


if __name__ == "__main__":
    B, Ny, Nx, C = 4, 8, 8, 32
    Ch = C // 2

    key = jax.random.PRNGKey(0)
    k_y, k_x, k_wq, k_wk, k_wv, k_bq, k_bk, k_bv = jax.random.split(key, 8)

    y = jax.random.normal(k_y, (B, Ny, C), dtype=jnp.float32)
    x = jax.random.normal(k_x, (B, Nx, C), dtype=jnp.float32)

    # Weights follow the module's __init__: normal(0, sqrt(2/(C//2))) for q/k,
    # normal(0, sqrt(2/C)) for v; biases use PyTorch Linear's default uniform.
    wq = jax.random.normal(k_wq, (Ch, C), dtype=jnp.float32) * math.sqrt(2.0 / Ch)
    wk = jax.random.normal(k_wk, (Ch, C), dtype=jnp.float32) * math.sqrt(2.0 / Ch)
    wv = jax.random.normal(k_wv, (C, C), dtype=jnp.float32) * math.sqrt(2.0 / C)
    bound = 1.0 / math.sqrt(C)
    bq = jax.random.uniform(k_bq, (Ch,), jnp.float32, -bound, bound)
    bk = jax.random.uniform(k_bk, (Ch,), jnp.float32, -bound, bound)
    bv = jax.random.uniform(k_bv, (C,), jnp.float32, -bound, bound)

    ref = cross_attn_ref(y, x, wq, bq, wk, bk, wv, bv)

    # Exact-math path (f32 MXU operands); tolerance covers only the EUP
    # approximate reciprocal in the softmax denominator.
    out_f32 = jax.block_until_ready(
        cross_attn(y, x, wq, bq, wk, bk, wv, bv, use_bf16=False))
    np.testing.assert_allclose(np.asarray(out_f32), np.asarray(ref),
                               rtol=5e-3, atol=5e-3)

    # Default fast path: bf16 MXU operands + f32 accumulation. The MXU is
    # bf16-native on v5e as well as v6e/v7x, so this is the recommended
    # configuration on every generation (documented as approximate).
    out_bf16 = jax.block_until_ready(cross_attn(y, x, wq, bq, wk, bk, wv, bv))
    np.testing.assert_allclose(np.asarray(out_bf16), np.asarray(ref),
                               rtol=5e-2, atol=5e-2)

    print("KERNEL_OK")
</pallas_src>

<mosaic_0001>
module attributes {stable_mosaic.version = 11 : i64} {
  func.func @_cross_attn_kernel(%arg0: i32, %arg1: memref<4x8x32xf32, #tpu.memory_space<vmem>>, %arg2: memref<4x8x32xf32, #tpu.memory_space<vmem>>, %arg3: memref<32x128xf32, #tpu.memory_space<vmem>>, %arg4: memref<1x128xf32, #tpu.memory_space<vmem>>, %arg5: memref<32x160xf32, #tpu.memory_space<vmem>>, %arg6: memref<1x160xf32, #tpu.memory_space<vmem>>, %arg7: memref<4x8x32xf32, #tpu.memory_space<vmem>>) attributes {dimension_semantics = [#tpu.dimension_semantics<parallel>], iteration_bounds = array<i64: 1>, scalar_prefetch = 0 : i64, scratch_operands = 0 : i64, tpu.core_type = #tpu.core_type<tc>, window_params = [{transform_indices = @transform_0, window_bounds = array<i64: 4, 8, 32>}, {transform_indices = @transform_1, window_bounds = array<i64: 4, 8, 32>}, {pipeline_mode = #tpu.pipeline_mode<synchronous>, transform_indices = @transform_2, window_bounds = array<i64: 32, 128>}, {pipeline_mode = #tpu.pipeline_mode<synchronous>, transform_indices = @transform_3, window_bounds = array<i64: 1, 128>}, {pipeline_mode = #tpu.pipeline_mode<synchronous>, transform_indices = @transform_4, window_bounds = array<i64: 32, 160>}, {pipeline_mode = #tpu.pipeline_mode<synchronous>, transform_indices = @transform_5, window_bounds = array<i64: 1, 160>}, {transform_indices = @transform_6, window_bounds = array<i64: 4, 8, 32>}]} {
    %c0 = arith.constant 0 : index
    %c0_0 = arith.constant 0 : index
    %c0_1 = arith.constant 0 : index
    %0 = vector.load %arg1[%c0, %c0_0, %c0_1] : memref<4x8x32xf32, #tpu.memory_space<vmem>>, vector<4x8x32xf32>
    %1 = vector.shape_cast %0 : vector<4x8x32xf32> to vector<32x32xf32>
    %c0_2 = arith.constant 0 : index
    %c0_3 = arith.constant 0 : index
    %c0_4 = arith.constant 0 : index
    %2 = vector.load %arg2[%c0_2, %c0_3, %c0_4] : memref<4x8x32xf32, #tpu.memory_space<vmem>>, vector<4x8x32xf32>
    %3 = vector.shape_cast %2 : vector<4x8x32xf32> to vector<32x32xf32>
    %c0_5 = arith.constant 0 : index
    %c0_6 = arith.constant 0 : index
    %4 = vector.load %arg3[%c0_5, %c0_6] : memref<32x128xf32, #tpu.memory_space<vmem>>, vector<32x128xf32>
    %cst = arith.constant dense<0.000000e+00> : vector<32x128xf32>
    %5 = tpu.matmul %1, %4, %cst {dimension_numbers = #tpu.dot_dimension_numbers<[1], [0], [0], [1], [0, 0, 1, 1], [], []>} : vector<32x32xf32>, vector<32x128xf32>, vector<32x128xf32> -> vector<32x128xf32>
    %c0_7 = arith.constant 0 : index
    %c0_8 = arith.constant 0 : index
    %6 = vector.load %arg4[%c0_7, %c0_8] : memref<1x128xf32, #tpu.memory_space<vmem>>, vector<1x128xf32>
    %7 = vector.broadcast %6 : vector<1x128xf32> to vector<32x128xf32>
    %8 = arith.addf %5, %7 : vector<32x128xf32>
    %c0_9 = arith.constant 0 : index
    %c0_10 = arith.constant 0 : index
    %9 = vector.load %arg5[%c0_9, %c0_10] : memref<32x160xf32, #tpu.memory_space<vmem>>, vector<32x160xf32>
    %cst_11 = arith.constant dense<0.000000e+00> : vector<32x160xf32>
    %10 = tpu.matmul %3, %9, %cst_11 {dimension_numbers = #tpu.dot_dimension_numbers<[1], [0], [0], [1], [0, 0, 1, 1], [], []>} : vector<32x32xf32>, vector<32x160xf32>, vector<32x160xf32> -> vector<32x160xf32>
    %c0_12 = arith.constant 0 : index
    %c0_13 = arith.constant 0 : index
    %11 = vector.load %arg6[%c0_12, %c0_13] : memref<1x160xf32, #tpu.memory_space<vmem>>, vector<1x160xf32>
    %12 = vector.broadcast %11 : vector<1x160xf32> to vector<32x160xf32>
    %13 = arith.addf %10, %12 : vector<32x160xf32>
    %14 = vector.shape_cast %8 : vector<32x128xf32> to vector<4x8x128xf32>
    %15 = vector.extract_strided_slice %13 {offsets = [0, 0], sizes = [32, 128], strides = [1, 1]} : vector<32x160xf32> to vector<32x128xf32>
    %16 = vector.shape_cast %15 : vector<32x128xf32> to vector<4x8x128xf32>
    %17 = vector.extract_strided_slice %13 {offsets = [0, 128], sizes = [32, 32], strides = [1, 1]} : vector<32x160xf32> to vector<32x32xf32>
    %18 = vector.shape_cast %17 : vector<32x32xf32> to vector<4x8x32xf32>
    %19 = arith.mulf %14, %14 : vector<4x8x128xf32>
    %cst_14 = arith.constant dense<0.000000e+00> : vector<4x128xf32>
    %20 = vector.multi_reduction <add>, %19, %cst_14 [1] : vector<4x8x128xf32> to vector<4x128xf32>
    %21 = vector.shape_cast %20 : vector<4x128xf32> to vector<4x1x128xf32>
    %cst_15 = arith.constant 1.000000e-24 : f32
    %22 = vector.broadcast %cst_15 : f32 to vector<4x1x128xf32>
    %23 = arith.maximumf %21, %22 : vector<4x1x128xf32>
    %24 = math.rsqrt %23 : vector<4x1x128xf32>
    %cst_16 = arith.constant 2.500000e-01 : f32
    %25 = vector.broadcast %cst_16 : f32 to vector<4x1x128xf32>
    %26 = arith.mulf %25, %24 : vector<4x1x128xf32>
    %27 = vector.broadcast %26 : vector<4x1x128xf32> to vector<4x8x128xf32>
    %28 = arith.mulf %14, %27 : vector<4x8x128xf32>
    %29 = arith.mulf %16, %16 : vector<4x8x128xf32>
    %cst_17 = arith.constant dense<0.000000e+00> : vector<4x128xf32>
    %30 = vector.multi_reduction <add>, %29, %cst_17 [1] : vector<4x8x128xf32> to vector<4x128xf32>
    %31 = vector.shape_cast %30 : vector<4x128xf32> to vector<4x1x128xf32>
    %cst_18 = arith.constant 1.000000e-24 : f32
    %32 = vector.broadcast %cst_18 : f32 to vector<4x1x128xf32>
    %33 = arith.maximumf %31, %32 : vector<4x1x128xf32>
    %34 = math.rsqrt %33 : vector<4x1x128xf32>
    %35 = vector.broadcast %34 : vector<4x1x128xf32> to vector<4x8x128xf32>
    %36 = arith.mulf %16, %35 : vector<4x8x128xf32>
    %cst_19 = arith.constant dense<0.000000e+00> : vector<4x8x8xf32>
    %37 = tpu.matmul %28, %36, %cst_19 {dimension_numbers = #tpu.dot_dimension_numbers<[2], [2], [1], [1], [0, 0, 0, 1, 1, 1], [0], [0]>} : vector<4x8x128xf32>, vector<4x8x128xf32>, vector<4x8x8xf32> -> vector<4x8x8xf32>
    %cst_20 = arith.constant dense<0xFF800000> : vector<4x8xf32>
    %38 = vector.multi_reduction <maximumf>, %37, %cst_20 [2] : vector<4x8x8xf32> to vector<4x8xf32>
    %39 = vector.shape_cast %38 : vector<4x8xf32> to vector<4x8x1xf32>
    %40 = vector.broadcast %39 : vector<4x8x1xf32> to vector<4x8x8xf32>
    %41 = arith.subf %37, %40 : vector<4x8x8xf32>
    %42 = math.exp %41 : vector<4x8x8xf32>
    %cst_21 = arith.constant dense<0.000000e+00> : vector<4x8xf32>
    %43 = vector.multi_reduction <add>, %42, %cst_21 [2] : vector<4x8x8xf32> to vector<4x8xf32>
    %44 = vector.shape_cast %43 : vector<4x8xf32> to vector<4x8x1xf32>
    %45 = tpu.reciprocal %44 {approx = true} : vector<4x8x1xf32> -> vector<4x8x1xf32>
    %46 = vector.broadcast %45 : vector<4x8x1xf32> to vector<4x8x8xf32>
    %47 = arith.mulf %42, %46 : vector<4x8x8xf32>
    %cst_22 = arith.constant dense<0.000000e+00> : vector<4x8x32xf32>
    %48 = tpu.matmul %47, %18, %cst_22 {dimension_numbers = #tpu.dot_dimension_numbers<[2], [1], [1], [2], [0, 0, 0, 1, 1, 2], [0], [0]>} : vector<4x8x8xf32>, vector<4x8x32xf32>, vector<4x8x32xf32> -> vector<4x8x32xf32>
    %c0_23 = arith.constant 0 : index
    %c0_24 = arith.constant 0 : index
    %c0_25 = arith.constant 0 : index
    %49 = vector.load %arg7[%c0_23, %c0_24, %c0_25] : memref<4x8x32xf32, #tpu.memory_space<vmem>>, vector<4x8x32xf32>
    tpu.vector_store %arg7[%c0_23, %c0_24, %c0_25], %48 {strides = array<i32>} : memref<4x8x32xf32, #tpu.memory_space<vmem>>, vector<4x8x32xf32>,
    return
  }
  func.func @transform_0(%arg0: i32) -> (i32, i32, i32) {
    %c0_i32 = arith.constant 0 : i32
    %c0_i32_0 = arith.constant 0 : i32
    %c0_i32_1 = arith.constant 0 : i32
    return %arg0, %c0_i32, %c0_i32_0 : i32, i32, i32
  }
  func.func @transform_1(%arg0: i32) -> (i32, i32, i32) {
    %c0_i32 = arith.constant 0 : i32
    %c0_i32_0 = arith.constant 0 : i32
    %c0_i32_1 = arith.constant 0 : i32
    return %arg0, %c0_i32, %c0_i32_0 : i32, i32, i32
  }
  func.func @transform_2(%arg0: i32) -> (i32, i32) {
    %c0_i32 = arith.constant 0 : i32
    %c0_i32_0 = arith.constant 0 : i32
    %c0_i32_1 = arith.constant 0 : i32
    return %c0_i32, %c0_i32_0 : i32, i32
  }
  func.func @transform_3(%arg0: i32) -> (i32, i32) {
    %c0_i32 = arith.constant 0 : i32
    %c0_i32_0 = arith.constant 0 : i32
    %c0_i32_1 = arith.constant 0 : i32
    return %c0_i32, %c0_i32_0 : i32, i32
  }
  func.func @transform_4(%arg0: i32) -> (i32, i32) {
    %c0_i32 = arith.constant 0 : i32
    %c0_i32_0 = arith.constant 0 : i32
    %c0_i32_1 = arith.constant 0 : i32
    return %c0_i32, %c0_i32_0 : i32, i32
  }
  func.func @transform_5(%arg0: i32) -> (i32, i32) {
    %c0_i32 = arith.constant 0 : i32
    %c0_i32_0 = arith.constant 0 : i32
    %c0_i32_1 = arith.constant 0 : i32
    return %c0_i32, %c0_i32_0 : i32, i32
  }
  func.func @transform_6(%arg0: i32) -> (i32, i32, i32) {
    %c0_i32 = arith.constant 0 : i32
    %c0_i32_0 = arith.constant 0 : i32
    %c0_i32_1 = arith.constant 0 : i32
    return %arg0, %c0_i32, %c0_i32_0 : i32, i32, i32
  }
}

module attributes {stable_mosaic.version = 11 : i64} {
  func.func @_cross_attn_kernel(%arg0: i32, %arg1: memref<4x8x32xf32, #tpu.memory_space<vmem>>, %arg2: memref<4x8x32xf32, #tpu.memory_space<vmem>>, %arg3: memref<32x128xf32, #tpu.memory_space<vmem>>, %arg4: memref<1x128xf32, #tpu.memory_space<vmem>>, %arg5: memref<32x160xf32, #tpu.memory_space<vmem>>, %arg6: memref<1x160xf32, #tpu.memory_space<vmem>>, %arg7: memref<4x8x32xf32, #tpu.memory_space<vmem>>) attributes {dimension_semantics = [#tpu.dimension_semantics<parallel>], iteration_bounds = array<i64: 1>, scalar_prefetch = 0 : i64, scratch_operands = 0 : i64, tpu.core_type = #tpu.core_type<tc>, window_params = [{transform_indices = @transform_0, window_bounds = array<i64: 4, 8, 32>}, {transform_indices = @transform_1, window_bounds = array<i64: 4, 8, 32>}, {pipeline_mode = #tpu.pipeline_mode<synchronous>, transform_indices = @transform_2, window_bounds = array<i64: 32, 128>}, {pipeline_mode = #tpu.pipeline_mode<synchronous>, transform_indices = @transform_3, window_bounds = array<i64: 1, 128>}, {pipeline_mode = #tpu.pipeline_mode<synchronous>, transform_indices = @transform_4, window_bounds = array<i64: 32, 160>}, {pipeline_mode = #tpu.pipeline_mode<synchronous>, transform_indices = @transform_5, window_bounds = array<i64: 1, 160>}, {transform_indices = @transform_6, window_bounds = array<i64: 4, 8, 32>}]} {
    %c0 = arith.constant 0 : index
    %c0_0 = arith.constant 0 : index
    %c0_1 = arith.constant 0 : index
    %0 = vector.load %arg1[%c0, %c0_0, %c0_1] : memref<4x8x32xf32, #tpu.memory_space<vmem>>, vector<4x8x32xf32>
    %1 = vector.shape_cast %0 : vector<4x8x32xf32> to vector<32x32xf32>
    %c0_2 = arith.constant 0 : index
    %c0_3 = arith.constant 0 : index
    %c0_4 = arith.constant 0 : index
    %2 = vector.load %arg2[%c0_2, %c0_3, %c0_4] : memref<4x8x32xf32, #tpu.memory_space<vmem>>, vector<4x8x32xf32>
    %3 = vector.shape_cast %2 : vector<4x8x32xf32> to vector<32x32xf32>
    %c0_5 = arith.constant 0 : index
    %c0_6 = arith.constant 0 : index
    %4 = vector.load %arg3[%c0_5, %c0_6] : memref<32x128xf32, #tpu.memory_space<vmem>>, vector<32x128xf32>
    %cst = arith.constant dense<0.000000e+00> : vector<32x128xf32>
    %5 = tpu.matmul %1, %4, %cst {dimension_numbers = #tpu.dot_dimension_numbers<[1], [0], [0], [1], [0, 0, 1, 1], [], []>} : vector<32x32xf32>, vector<32x128xf32>, vector<32x128xf32> -> vector<32x128xf32>
    %c0_7 = arith.constant 0 : index
    %c0_8 = arith.constant 0 : index
    %6 = vector.load %arg4[%c0_7, %c0_8] : memref<1x128xf32, #tpu.memory_space<vmem>>, vector<1x128xf32>
    %7 = vector.broadcast %6 : vector<1x128xf32> to vector<32x128xf32>
    %8 = arith.addf %5, %7 : vector<32x128xf32>
    %c0_9 = arith.constant 0 : index
    %c0_10 = arith.constant 0 : index
    %9 = vector.load %arg5[%c0_9, %c0_10] : memref<32x160xf32, #tpu.memory_space<vmem>>, vector<32x160xf32>
    %cst_11 = arith.constant dense<0.000000e+00> : vector<32x160xf32>
    %10 = tpu.matmul %3, %9, %cst_11 {dimension_numbers = #tpu.dot_dimension_numbers<[1], [0], [0], [1], [0, 0, 1, 1], [], []>} : vector<32x32xf32>, vector<32x160xf32>, vector<32x160xf32> -> vector<32x160xf32>
    %c0_12 = arith.constant 0 : index
    %c0_13 = arith.constant 0 : index
    %11 = vector.load %arg6[%c0_12, %c0_13] : memref<1x160xf32, #tpu.memory_space<vmem>>, vector<1x160xf32>
    %12 = vector.broadcast %11 : vector<1x160xf32> to vector<32x160xf32>
    %13 = arith.addf %10, %12 : vector<32x160xf32>
    %14 = vector.shape_cast %8 : vector<32x128xf32> to vector<4x8x128xf32>
    %15 = vector.extract_strided_slice %13 {offsets = [0, 0], sizes = [32, 128], strides = [1, 1]} : vector<32x160xf32> to vector<32x128xf32>
    %16 = vector.shape_cast %15 : vector<32x128xf32> to vector<4x8x128xf32>
    %17 = vector.extract_strided_slice %13 {offsets = [0, 128], sizes = [32, 32], strides = [1, 1]} : vector<32x160xf32> to vector<32x32xf32>
    %18 = vector.shape_cast %17 : vector<32x32xf32> to vector<4x8x32xf32>
    %19 = arith.mulf %14, %14 : vector<4x8x128xf32>
    %cst_14 = arith.constant dense<0.000000e+00> : vector<4x128xf32>
    %20 = vector.multi_reduction <add>, %19, %cst_14 [1] : vector<4x8x128xf32> to vector<4x128xf32>
    %21 = vector.shape_cast %20 : vector<4x128xf32> to vector<4x1x128xf32>
    %cst_15 = arith.constant 1.000000e-24 : f32
    %22 = vector.broadcast %cst_15 : f32 to vector<4x1x128xf32>
    %23 = arith.maximumf %21, %22 : vector<4x1x128xf32>
    %24 = math.rsqrt %23 : vector<4x1x128xf32>
    %cst_16 = arith.constant 2.500000e-01 : f32
    %25 = vector.broadcast %cst_16 : f32 to vector<4x1x128xf32>
    %26 = arith.mulf %25, %24 : vector<4x1x128xf32>
    %27 = vector.broadcast %26 : vector<4x1x128xf32> to vector<4x8x128xf32>
    %28 = arith.mulf %14, %27 : vector<4x8x128xf32>
    %29 = arith.mulf %16, %16 : vector<4x8x128xf32>
    %cst_17 = arith.constant dense<0.000000e+00> : vector<4x128xf32>
    %30 = vector.multi_reduction <add>, %29, %cst_17 [1] : vector<4x8x128xf32> to vector<4x128xf32>
    %31 = vector.shape_cast %30 : vector<4x128xf32> to vector<4x1x128xf32>
    %cst_18 = arith.constant 1.000000e-24 : f32
    %32 = vector.broadcast %cst_18 : f32 to vector<4x1x128xf32>
    %33 = arith.maximumf %31, %32 : vector<4x1x128xf32>
    %34 = math.rsqrt %33 : vector<4x1x128xf32>
    %35 = vector.broadcast %34 : vector<4x1x128xf32> to vector<4x8x128xf32>
    %36 = arith.mulf %16, %35 : vector<4x8x128xf32>
    %cst_19 = arith.constant dense<0.000000e+00> : vector<4x8x8xf32>
    %37 = tpu.matmul %28, %36, %cst_19 {dimension_numbers = #tpu.dot_dimension_numbers<[2], [2], [1], [1], [0, 0, 0, 1, 1, 1], [0], [0]>} : vector<4x8x128xf32>, vector<4x8x128xf32>, vector<4x8x8xf32> -> vector<4x8x8xf32>
    %cst_20 = arith.constant dense<0xFF800000> : vector<4x8xf32>
    %38 = vector.multi_reduction <maximumf>, %37, %cst_20 [2] : vector<4x8x8xf32> to vector<4x8xf32>
    %39 = vector.shape_cast %38 : vector<4x8xf32> to vector<4x8x1xf32>
    %40 = vector.broadcast %39 : vector<4x8x1xf32> to vector<4x8x8xf32>
    %41 = arith.subf %37, %40 : vector<4x8x8xf32>
    %42 = math.exp %41 : vector<4x8x8xf32>
    %cst_21 = arith.constant dense<0.000000e+00> : vector<4x8xf32>
    %43 = vector.multi_reduction <add>, %42, %cst_21 [2] : vector<4x8x8xf32> to vector<4x8xf32>
    %44 = vector.shape_cast %43 : vector<4x8xf32> to vector<4x8x1xf32>
    %45 = tpu.reciprocal %44 {approx = true} : vector<4x8x1xf32> -> vector<4x8x1xf32>
    %46 = vector.broadcast %45 : vector<4x8x1xf32> to vector<4x8x8xf32>
    %47 = arith.mulf %42, %46 : vector<4x8x8xf32>
    %cst_22 = arith.constant dense<0.000000e+00> : vector<4x8x32xf32>
    %48 = tpu.matmul %47, %18, %cst_22 {dimension_numbers = #tpu.dot_dimension_numbers<[2], [1], [1], [2], [0, 0, 0, 1, 1, 2], [0], [0]>} : vector<4x8x8xf32>, vector<4x8x32xf32>, vector<4x8x32xf32> -> vector<4x8x32xf32>
    %c0_23 = arith.constant 0 : index
    %c0_24 = arith.constant 0 : index
    %c0_25 = arith.constant 0 : index
    %49 = vector.load %arg7[%c0_23, %c0_24, %c0_25] : memref<4x8x32xf32, #tpu.memory_space<vmem>>, vector<4x8x32xf32>
    tpu.vector_store %arg7[%c0_23, %c0_24, %c0_25], %48 {strides = array<i32>} : memref<4x8x32xf32, #tpu.memory_space<vmem>>, vector<4x8x32xf32>,
    return
  }
  func.func @transform_0(%arg0: i32) -> (i32, i32, i32) {
    %c0_i32 = arith.constant 0 : i32
    %c0_i32_0 = arith.constant 0 : i32
    %c0_i32_1 = arith.constant 0 : i32
    return %arg0, %c0_i32, %c0_i32_0 : i32, i32, i32
  }
  func.func @transform_1(%arg0: i32) -> (i32, i32, i32) {
    %c0_i32 = arith.constant 0 : i32
    %c0_i32_0 = arith.constant 0 : i32
    %c0_i32_1 = arith.constant 0 : i32
    return %arg0, %c0_i32, %c0_i32_0 : i32, i32, i32
  }
  func.func @transform_2(%arg0: i32) -> (i32, i32) {
    %c0_i32 = arith.constant 0 : i32
    %c0_i32_0 = arith.constant 0 : i32
    %c0_i32_1 = arith.constant 0 : i32
    return %c0_i32, %c0_i32_0 : i32, i32
  }
  func.func @transform_3(%arg0: i32) -> (i32, i32) {
    %c0_i32 = arith.constant 0 : i32
    %c0_i32_0 = arith.constant 0 : i32
    %c0_i32_1 = arith.constant 0 : i32
    return %c0_i32, %c0_i32_0 : i32, i32
  }
  func.func @transform_4(%arg0: i32) -> (i32, i32) {
    %c0_i32 = arith.constant 0 : i32
    %c0_i32_0 = arith.constant 0 : i32
    %c0_i32_1 = arith.constant 0 : i32
    return %c0_i32, %c0_i32_0 : i32, i32
  }
  func.func @transform_5(%arg0: i32) -> (i32, i32) {
    %c0_i32 = arith.constant 0 : i32
    %c0_i32_0 = arith.constant 0 : i32
    %c0_i32_1 = arith.constant 0 : i32
    return %c0_i32, %c0_i32_0 : i32, i32
  }
  func.func @transform_6(%arg0: i32) -> (i32, i32, i32) {
    %c0_i32 = arith.constant 0 : i32
    %c0_i32_0 = arith.constant 0 : i32
    %c0_i32_1 = arith.constant 0 : i32
    return %arg0, %c0_i32, %c0_i32_0 : i32, i32, i32
  }
}

</mosaic_0001>

<bundles_post_ra>
// kernel: tpu_custom_call.1
= control target key start
LH: loop header
LB: loop body
LE: loop exit
PB: predicated region body
PF: predicated region fallthrough
CT: control target
= control target key end

     0   :  { %11 = vsyncpa [#allocation3], 0  ;;  %s1469_s0 = inlined_call_operand.hbm [shape: f32[4,8,32], index: 0, kind: input, shape index: {}]   ;;  %s1470_s1 = inlined_call_operand.hbm [shape: f32[4,8,32], index: 1, kind: input, shape index: {}]   ;;  %s1471_s2 = inlined_call_operand.hbm [shape: f32[32,128], index: 2, kind: input, shape index: {}]   ;;  %s1472_s3 = inlined_call_operand.vmem [shape: f32[1,128], index: 3, kind: input, shape index: {}]   ;;  %s1473_s4 = inlined_call_operand.hbm [shape: f32[32,160], index: 4, kind: input, shape index: {}]   ;;  %s1474_s5 = inlined_call_operand.vmem [shape: f32[1,160], index: 5, kind: input, shape index: {}]   ;;  %s1475_s6 = inlined_call_operand.hbm [shape: f32[4,8,32], index: 6, kind: output, shape index: {}]  }
   0x1   :  { %12 = vsyncpa [#allocation6], 0 }
   0x2   :  { %13 = vsyncpa [#allocation9], 0 }
   0x3   :  { %14 = vsyncpa [#allocation4], 0  ;;  %s1283_s21 = smov [#allocation5]   ;;  %s1284_s23 = smov [#allocation2]  }
   0x4   :  { %s32_s22 = sshll.u32 %s1283_s21, 4  ;;  %s20_s24 = sshll.u32 %s1284_s23, 4  ;;  %s33_s22 = int_to_ptr.vmem [resolvable:$true] %s32_s22  ;;  %s21_s24 = int_to_ptr.vmem [resolvable:$true] %s20_s24 }
   0x5   :  { %s1183_s25 = scalar_lea.vmem %s33_s22, 512  ;;  %p1188_p1 = scmp.lt.s32.totalorder %s33_s22, %s33_s22 }
   0x6   :  { %p1184_p0 = scmp.ne.s32.totalorder %s33_s22, %s1183_s25  ;;  %p1189_p2 = scmp.lt.s32.totalorder %s1183_s25, %s1183_s25 }
   0x8   :  { %p1190_p3 = por %p1189_p2, %p1188_p1 }
   0xa   :  { %p1191_p4 = pnand %p1190_p3, %p1184_p0 }
   0xc   :  { %1194 = shalt.err (!%p1191_p4)
}
   0xd   :  { %s1285_s26 = smov 128   ;;  %s1286_s27 = smov 8  }
   0xe   :  { %38 = dma.hbm_to_vmem [thread:$0]  %s1470_s1, 512, %s33_s22, [#allocation6], %s1285_s26, %s1285_s26, %s1286_s27  }
   0xf   :  { %s1203_s30 = scalar_lea.vmem %s21_s24, 512  ;;  %p1208_p6 = scmp.lt.s32.totalorder %s21_s24, %s21_s24 }
  0x10   :  { %p1204_p5 = scmp.ne.s32.totalorder %s21_s24, %s1203_s30  ;;  %p1209_p7 = scmp.lt.s32.totalorder %s1203_s30, %s1203_s30 }
  0x12   :  { %p1210_p8 = por %p1209_p7, %p1208_p6 }
  0x14   :  { %p1211_p9 = pnand %p1210_p8, %p1204_p5 }
  0x16   :  { %1214 = shalt.err (!%p1211_p9)
}
  0x17   :  { %26 = dma.hbm_to_vmem [thread:$0]  %s1469_s0, 512, %s21_s24, [#allocation3], %s1285_s26, %s1285_s26, %s1286_s27  }
  0x18   :  { %s1287_s9 = smov [#allocation7]   ;;  %s1288_s11 = smov [#allocation8]  }
  0x19   :  { %s44_s10 = sshll.u32 %s1287_s9, 4  ;;  %s58_s12 = sshll.u32 %s1288_s11, 4  ;;  %s45_s10 = int_to_ptr.vmem [resolvable:$true] %s44_s10  ;;  %s59_s12 = int_to_ptr.vmem [resolvable:$true] %s58_s12 }
  0x1a   :  { %s1223_s1 = scalar_lea.vmem %s45_s10, 512  ;;  %p1228_p11 = scmp.lt.s32.totalorder %s45_s10, %s45_s10 }
  0x1b   :  { %p1224_p10 = scmp.ne.s32.totalorder %s45_s10, %s1223_s1  ;;  %p1229_p12 = scmp.lt.s32.totalorder %s1223_s1, %s1223_s1 }
  0x1d   :  { %p1230_p13 = por %p1229_p12, %p1228_p11 }
  0x1f   :  { %p1231_p0 = pnand %p1230_p13, %p1224_p10 }
  0x21   :  { %1234 = shalt.err (!%p1231_p0)
}
  0x22   :  { %50 = dma.hbm_to_vmem [thread:$0]  %s1471_s2, 512, %s45_s10, [#allocation6], %s1285_s26, %s1285_s26, %s1286_s27  }
  0x23   :  { %s1243_s0 = scalar_lea.vmem %s59_s12, 1024  ;;  %p1248_p2 = scmp.lt.s32.totalorder %s59_s12, %s59_s12 }
  0x24   :  { %p1244_p1 = scmp.ne.s32.totalorder %s59_s12, %s1243_s0  ;;  %p1249_p3 = scmp.lt.s32.totalorder %s1243_s0, %s1243_s0 }
  0x26   :  { %p1250_p4 = por %p1249_p3, %p1248_p2 }
  0x28   :  { %p1251_p5 = pnand %p1250_p4, %p1244_p1 }
  0x2a   :  { %1254 = shalt.err (!%p1251_p5)
}
  0x2b   :  { %s1289_s15 = smov 256   ;;  %s1290_s16 = smov 16  }
  0x2c   :  { %64 = dma.hbm_to_vmem [thread:$0]  %s1473_s4, 1024, %s59_s12, [#allocation9], %s1289_s15, %s1289_s15, %s1290_s16  }
  0x2d   :  { %1275 = dma.done.wait [#allocation3], 512  }
  0x2e   :  { %1276 = vsyncadd [#allocation3], 4294966784 }
  0x2f   :  { %1277 = dma.done.wait [#allocation6], 1024  }
  0x30   :  { %1278 = vsyncadd [#allocation6], 4294966272 }
  0x31   :  { %1279 = dma.done.wait [#allocation9], 1024  }
  0x32   :  { %1280 = vsyncadd [#allocation9], 4294966272  ;;  %v1291_v0 = vmov 0.0   ;;  %v90_v1 = vld [vmem:[#allocation7 + $0x18] sm:$0xff]  ;;  %v202_v3 = vld [vmem:[#allocation8 + $0x30] sm:$0xff]  ;;  %vm98_vm0 = vcmask 261120   ;;  %v206_v21 = vlaneseq }
  0x33   :  { %292 = vmatprep.mubr.f32.mxu1 %v1291_v0  ;;  %v203_v2 = vld [vmem:[#allocation8 + $0x38] sm:$0xff]  ;;  %1078 = vmatprep.subr.mxu0 %v90_v1  ;;  %v89_v4 = vld [vmem:[#allocation7 + $0x10] sm:$0xff]  ;;  %v201_v5 = vld [vmem:[#allocation8 + $0x28] sm:$0xff]  ;;  %vm1292_vm1 = vmmov 0   ;;  %vm681_vm2 = vcmask 64512  }
  0x34   :  { %252 = vmatprep.subr.mxu1 %v203_v2  ;;  %v200_v6 = vld [vmem:[#allocation8 + $0x20] sm:$0xff]  ;;  %1079 = vmatpush3.msra.mxu0 %v90_v1  ;;  %v88_v7 = vld [vmem:[#allocation7 + $0x8] sm:$0xff]  ;;  %v199_v8 = vld [vmem:[#allocation8 + $0x18] sm:$0xff]  ;;  %v207_v22 = vshrl.u32 %v206_v21, 7 }
  0x35   :  { %253 = vmatpush1.msra.mxu1 %v202_v3  ;;  %1080 = vmatprep.subr.mxu0 %v89_v4  ;;  %v198_v9 = vld [vmem:[#allocation8 + $0x10] sm:$0xff]  ;;  %v87_v10 = vld [vmem:[#allocation7] sm:$0xff]  ;;  %v197_v11 = vld [vmem:[#allocation8 + $0x8] sm:$0xff] }
  0x36   :  { %254 = vmatprep.subr.mxu1 %v201_v5  ;;  %1081 = vmatpush3.msra.mxu0 %v89_v4  ;;  %v79_v12 = vld [vmem:[#allocation2] sm:$0xff]  ;;  %v80_v14 = vld [vmem:[#allocation2 + $0x8] sm:$0xff]  ;;  %v81_v16 = vld [vmem:[#allocation2 + $0x10] sm:$0xff]  ;;  %v208_v23 = vsub.s32 0, %v207_v22  ;;  %v212_v42 = vsub.s32 1, %v207_v22 }
  0x37   :  { %255 = vmatpush1.msra.mxu1 %v200_v6  ;;  %1082 = vmatprep.subr.mxu0 %v88_v7  ;;  %v196_v13 = vld [vmem:[#allocation8] sm:$0xff]  ;;  %v82_v17 = vld [vmem:[#allocation2 + $0x18] sm:$0xff]  ;;  %v84_v18 = vld [vmem:[#allocation5 + $0x8] sm:$0xff] }
  0x38   :  { %256 = vmatprep.subr.mxu1 %v199_v8  ;;  %1083 = vmatpush3.msra.mxu0 %v88_v7  ;;  %v83_v15 = vld [vmem:[#allocation5] sm:$0xff]  ;;  %v85_v19 = vld [vmem:[#allocation5 + $0x10] sm:$0xff]  ;;  %v86_v20 = vld [vmem:[#allocation5 + $0x18] sm:$0xff] }
  0x39   :  { %257 = vmatpush1.msra.mxu1 %v198_v9  ;;  %1084 = vmatprep.subr.mxu0 %v87_v10  ;;  %v204_v24 = vld [vmem:[%s1474_s5] sm:$0x3] }
  0x3a   :  { %258 = vmatprep.subr.mxu1 %v197_v11  ;;  %1085 = vmatpush3.msra.mxu0 %v87_v10  ;;  %v1041_v25 = vld [vmem:[%s1472_s3] ss:$0 sm:$0xff]  ;;  %v209_v26 = vrot.slane %v204_v24, %v208_v23  ;;  %v1402_v58 = vrot.slane %v204_v24, %v212_v42  ;;  %s1293_s3 = smov [#allocation10]  }
  0x3b   :  { %1086 = vmatprep.mubr.msk.f32.mxu0 %vm98_vm0, %v79_v12  ;;  %259 = vmatpush1.msra.mxu1 %v196_v13  ;;  %s1027_s5 = sshll.u32 %s1293_s3, 4  ;;  %s1028_s5 = int_to_ptr.vmem [resolvable:$true] %s1027_s5 }
  0x3c   :  { %1087 = vmatmul.mubr.msk.f32.vlgmr.msra.gmra.mxu0 %vm98_vm0, %v80_v14  ;;  %1046 = vmatmul.mubr.msk.f32.vlgmr.msra.gmra.mxu1 %vm98_vm0, %v83_v15  ;;  %s1255_s21 = scalar_lea.vmem %s1028_s5, 512  ;;  %p1260_p7 = scmp.lt.s32.totalorder %s1028_s5, %s1028_s5 }
  0x3d   :  { %1089 = vmatprep.mubr.msk.f32.mxu0 %vm98_vm0, %v81_v16  ;;  %298 = vmatprep.mubr.f32.mxu1 %v1291_v0  ;;  %p1256_p6 = scmp.ne.s32.totalorder %s1028_s5, %s1255_s21  ;;  %p1261_p8 = scmp.lt.s32.totalorder %s1255_s21, %s1255_s21 }
  0x3e   :  { %1092 = vmatprep.subr.mxu0 %v1291_v0  ;;  %1107 = vmatprep.subr.mxu1 %v1291_v0 }
  0x3f   :  { %p1262_p9 = por %p1261_p8, %p1260_p7 }
  0x40   :  { %1090 = vmatmul.mubr.msk.f32.gmra.mxu0 %vm98_vm0, %v82_v17  ;;  %1047 = vmatmul.mubr.msk.f32.gmra.mxu1 %vm98_vm0, %v84_v18 }
  0x41   :  { %304 = vmatprep.mubr.f32.mxu1 %v1291_v0  ;;  %1094 = vmatprep.mubr.msk.f32.mxu0 %vm1292_vm1, %v1291_v0  ;;  %p1263_p10 = pnand %p1262_p9, %p1256_p6 }
  0x44   :  { %1048 = vmatmul.mubr.msk.f32.gmra.mxu1 %vm98_vm0, %v85_v19 }
  0x45   :  { %310 = vmatprep.mubr.f32.mxu1 %v1291_v0 }
  0x48   :  { %1049 = vmatmul.mubr.msk.f32.gmra.mxu1 %vm98_vm0, %v86_v20 }
  0x49   :  { %1109 = vmatprep.mubr.msk.f32.mxu1 %vm1292_vm1, %v1291_v0 }
  0xfc   :  { %v1088_v27 = vpop.f32.mrf.mxu0  ;;  %v294_v29 = vpop.f32.mrf.mxu1 }
  0xfd   :  { %v1374_v28 = vadd.f32 %v1088_v27, %v1041_v25  ;;  %v1376_v30 = vadd.f32 %v294_v29, %v209_v26 }
  0xfe   :  { %v177_v31 = vpop.f32.mrf.mxu0  ;;  %v1382_v34 = vpop.f32.mrf.mxu1 }
  0xff   :  { %v318_v32 = vmul.f32 %v1374_v28, %v1374_v28  ;;  %v1380_v33 = vadd.f32 %v1041_v25, %v177_v31  ;;  %v361_v35 = vmul.f32 %v1376_v30, %v1376_v30 }
 0x100   :  { %v1091_v36 = vpop.f32.mrf.mxu0  ;;  %v300_v40 = vpop.f32.mrf.mxu1 }
 0x101   :  { %v327_v37 = vrot.slane %v318_v32, 4  ;;  %v317_v38 = vmul.f32 %v1380_v33, %v1380_v33  ;;  %v1388_v39 = vadd.f32 %v1091_v36, %v1041_v25  ;;  %v365_v41 = vrot.slane %v361_v35, 4 }
 0x102   :  { %v1390_v43 = vadd.f32 %v300_v40, %v209_v26  ;;  %v187_v44 = vpop.f32.mrf.mxu0  ;;  %v1396_v49 = vpop.f32.mrf.mxu1 }
 0x103   :  { %v328_v45 = vadd.f32 %v327_v37, %v318_v32  ;;  %v321_v46 = vrot.slane %v317_v38, 4  ;;  %v320_v47 = vmul.f32 %v1388_v39, %v1388_v39  ;;  %v1394_v48 = vadd.f32 %v1041_v25, %v187_v44 }
 0x104   :  { %v366_v50 = vadd.f32 %v365_v41, %v361_v35  ;;  %v362_v51 = vmul.f32 %v1390_v43, %v1390_v43  ;;  %v306_v56 = vpop.f32.mrf.mxu1 }
 0x105   :  { %v329_v52 = vrot.slane %v328_v45, 2  ;;  %v322_v53 = vadd.f32 %v321_v46, %v317_v38  ;;  %v339_v54 = vrot.slane %v320_v47, 4  ;;  %v319_v55 = vmul.f32 %v1394_v48, %v1394_v48 }
 0x106   :  { %v367_v57 = vrot.slane %v366_v50, 2  ;;  %v371_v59 = vrot.slane %v362_v51, 4  ;;  %v1404_v60 = vadd.f32 %v306_v56, %v209_v26  ;;  %v308_v2 = vpop.f32.mrf.mxu1 }
 0x107   :  { %v330_v61 = vadd.f32 %v329_v52, %v328_v45  ;;  %v323_v62 = vrot.slane %v322_v53, 2  ;;  %v340_v63 = vadd.f32 %v339_v54, %v320_v47  ;;  %v333_v1 = vrot.slane %v319_v55, 4 }
 0x108   :  { %v368_v3 = vadd.f32 %v367_v57, %v366_v50  ;;  %v372_v4 = vadd.f32 %v371_v59, %v362_v51  ;;  %v363_v5 = vmul.f32 %v1404_v60, %v1404_v60  ;;  %v1409_v6 = vadd.f32 %v308_v2, %v1402_v58  ;;  %v312_v11 = vpop.f32.mrf.mxu1 }
 0x109   :  { %v331_v7 = vrot.slane %v330_v61, 1  ;;  %v324_v8 = vadd.f32 %v323_v62, %v322_v53  ;;  %v341_v9 = vrot.slane %v340_v63, 2  ;;  %v334_v10 = vadd.f32 %v333_v1, %v319_v55 }
 0x10a   :  { %v369_v12 = vrot.slane %v368_v3, 1  ;;  %v373_v13 = vrot.slane %v372_v4, 2  ;;  %v377_v14 = vrot.slane %v363_v5, 4  ;;  %v1411_v15 = vadd.f32 %v312_v11, %v209_v26 }
 0x10b   :  { %v332_v16 = vadd.f32 %v331_v7, %v330_v61  ;;  %v325_v17 = vrot.slane %v324_v8, 1  ;;  %v342_v18 = vadd.f32 %v341_v9, %v340_v63  ;;  %v335_v19 = vrot.slane %v334_v10, 2 }
 0x10c   :  { %v370_v20 = vadd.f32 %v369_v12, %v368_v3  ;;  %v374_v21 = vadd.f32 %v373_v13, %v372_v4  ;;  %v378_v22 = vadd.f32 %v377_v14, %v363_v5  ;;  %v364_v23 = vmul.f32 %v1411_v15, %v1411_v15 }
 0x10d   :  { %v346_v24 = vmax.f32 %v332_v16, 1e-24  ;;  %v326_v25 = vadd.f32 %v325_v17, %v324_v8  ;;  %v343_v27 = vrot.slane %v342_v18, 1  ;;  %v336_v29 = vadd.f32 %v335_v19, %v334_v10  ;;  %v314_v19 = vpop.f32.mrf.mxu1 }
 0x10e   :  { %v389_v31 = vmax.f32 %v370_v20, 1e-24  ;;  %v375_v32 = vrot.slane %v374_v21, 1  ;;  %v379_v35 = vrot.slane %v378_v22, 2  ;;  %v383_v36 = vrot.slane %v364_v23, 4 }
 0x10f   :  { %1143 = vrsqrt.f32 %v346_v24  ;;  %v345_v26 = vmax.f32 %v326_v25, 1e-24  ;;  %v337_v37 = vrot.slane %v336_v29, 1  ;;  %v344_v42 = vadd.f32 %v343_v27, %v342_v18 }
 0x110   :  { %1145 = vrsqrt.f32 %v389_v31  ;;  %v376_v38 = vadd.f32 %v375_v32, %v374_v21  ;;  %v380_v40 = vadd.f32 %v379_v35, %v378_v22  ;;  %v384_v41 = vadd.f32 %v383_v36, %v364_v23 }
 0x111   :  { %1147 = vrsqrt.f32 %v345_v26  ;;  %v338_v44 = vadd.f32 %v337_v37, %v336_v29  ;;  %v348_v53 = vmax.f32 %v344_v42, 1e-24 }
 0x112   :  { %v390_v45 = vmax.f32 %v376_v38, 1e-24  ;;  %v381_v46 = vrot.slane %v380_v40, 1  ;;  %v385_v47 = vrot.slane %v384_v41, 2 }
 0x113   :  { %v347_v50 = vmax.f32 %v338_v44, 1e-24 }
 0x114   :  { %1149 = vrsqrt.f32 %v390_v45  ;;  %v382_v51 = vadd.f32 %v381_v46, %v380_v40  ;;  %v386_v52 = vadd.f32 %v385_v47, %v384_v41 }
 0x115   :  { %1151 = vrsqrt.f32 %v347_v50 }
 0x116   :  { %v391_v54 = vmax.f32 %v382_v51, 1e-24  ;;  %v387_v55 = vrot.slane %v386_v52, 1 }
 0x118   :  { %1153 = vrsqrt.f32 %v391_v54  ;;  %v388_v56 = vadd.f32 %v387_v55, %v386_v52 }
 0x119   :  { %1155 = vrsqrt.f32 %v348_v53 }
 0x11a   :  { %v392_v57 = vmax.f32 %v388_v56, 1e-24 }
 0x11c   :  { %v1144_v59 = vpop.eup %1143  ;;  %1157 = vrsqrt.f32 %v392_v57 }
 0x11d   :  { %v1146_v61 = vpop.eup %1145  ;;  %v354_v3 = vmul.f32 0.25, %v1144_v59 }
 0x11e   :  { %v1148_v62 = vpop.eup %1147  ;;  %v397_v63 = vmul.f32 %v1146_v61, %v1376_v30 }
 0x11f   :  { %v353_v1 = vmul.f32 0.25, %v1148_v62  ;;  %v358_v9 = vmul.f32 %v354_v3, %v1374_v28  ;;  %v297_v28 = vadd.f32 %v1382_v34, %v1402_v58  ;;  %v315_v62 = vadd.f32 %v314_v19, %v1402_v58 }
 0x120   :  { %1093 = vmatpush3.xpose.msra.mxu0 %v397_v63 }
 0x121   :  { %v1150_v2 = vpop.eup %1149  ;;  %v357_v4 = vmul.f32 %v353_v1, %v1380_v33  ;;  %1097 = vmatprep.subr.mxu0 %v1291_v0 }
 0x122   :  { %v1152_v5 = vpop.eup %1151  ;;  %v398_v7 = vmul.f32 %v1150_v2, %v1390_v43 }
 0x123   :  { %1095 = vmatmul.mubr.f32.vlgmr.msra.gmra.mxu0 %v357_v4  ;;  %v355_v30 = vmul.f32 0.25, %v1152_v5 }
 0x124   :  { %1098 = vmatpush3.xpose.msra.mxu0 %v398_v7  ;;  %1099 = vmatprep.mubr.msk.f32.mxu0 %vm1292_vm1, %v1291_v0 }
 0x125   :  { %v1154_v8 = vpop.eup %1153  ;;  %1102 = vmatprep.subr.mxu0 %v1291_v0  ;;  %v359_v12 = vmul.f32 %v355_v30, %v1394_v48  ;;  %v303_v48 = vadd.f32 %v1396_v49, %v1402_v58 }
 0x126   :  { %v1156_v10 = vpop.eup %1155  ;;  %v399_v11 = vmul.f32 %v1154_v8, %v1404_v60 }
 0x127   :  { %1100 = vmatmul.mubr.f32.vlgmr.msra.gmra.mxu0 %v358_v9  ;;  %v356_v43 = vmul.f32 0.25, %v1156_v10 }
 0x128   :  { %1103 = vmatpush3.xpose.msra.mxu0 %v399_v11  ;;  %1104 = vmatprep.mubr.msk.f32.mxu0 %vm1292_vm1, %v1291_v0 }
 0x129   :  { %v1158_v33 = vpop.eup %1157  ;;  %1112 = vmatprep.subr.mxu0 %v1291_v0  ;;  %v360_v60 = vmul.f32 %v356_v43, %v1388_v39 }
 0x12a   :  { %v400_v13 = vmul.f32 %v1158_v33, %v1411_v15 }
 0x12b   :  { %1105 = vmatmul.mubr.f32.vlgmr.msra.gmra.mxu0 %v359_v12 }
 0x12c   :  { %1108 = vmatpush3.xpose.msra.mxu1 %v400_v13  ;;  %1113 = vmatpush3.msra.mxu0 %v297_v28 }
 0x12d   :  { %1117 = vmatprep.subr.mxu1 %v1291_v0  ;;  %1114 = vmatprep.mubr.msk.f32.mxu0 %vm1292_vm1, %v1291_v0 }
 0x12e   :  { %1122 = vmatprep.subr.mxu0 %v1291_v0 }
 0x12f   :  { %1110 = vmatmul.mubr.f32.vlgmr.msra.gmra.mxu1 %v360_v60 }
 0x130   :  { %1118 = vmatpush3.msra.mxu1 %v303_v48  ;;  %1119 = vmatprep.mubr.msk.f32.mxu1 %vm1292_vm1, %v1291_v0 }
 0x131   :  { %1127 = vmatprep.subr.mxu1 %v1291_v0 }
 0x1e3   :  { %v467_v34 = vpop.f32.mrf.mxu0 }
 0x1e4   :  { %v682_v39 = vsel %vm681_vm2, %v467_v34, -inf }
 0x1e5   :  { %683 = vmax.xlane.f32.xlu0 %v682_v39  ;;  %v1096_v14 = vpop.f32.mrf.mxu0 }
 0x1e7   :  { %v537_v15 = vpop.f32.mrf.mxu0 }
 0x1e8   :  { %v685_v16 = vsel %vm681_vm2, %v537_v15, -inf }
 0x1e9   :  { %686 = vmax.xlane.f32.xlu0 %v685_v16  ;;  %v1101_v49 = vpop.f32.mrf.mxu0 }
 0x1eb   :  { %v607_v17 = vpop.f32.mrf.mxu0 }
 0x1ec   :  { %v688_v18 = vsel %vm681_vm2, %v607_v17, -inf }
 0x1ed   :  { %689 = vmax.xlane.f32.xlu1 %v688_v18  ;;  %v1106_v20 = vpop.f32.mrf.mxu0 }
 0x1ef   :  { %v677_v21 = vpop.f32.mrf.mxu1 }
 0x1f0   :  { %v691_v22 = vsel %vm681_vm2, %v677_v21, -inf }
 0x1f1   :  { %v1111_v23 = vpop.f32.mrf.mxu1  ;;  %692 = vmax.xlane.f32.xlu1 %v691_v22 }
 0x26e   :  { %v684_v24 = vpop.xlane.xlu0 %683 }
 0x26f   :  { %v694_v25 = vsub.f32 %v467_v34, %v684_v24 }
 0x271   :  { %v698_v27 = vmul.f32 1.442695, %v694_v25 }
 0x272   :  { %v687_v29 = vpop.xlane.xlu0 %686 }
 0x273   :  { %1159 = vpow2.f32 %v698_v27  ;;  %v695_v31 = vsub.f32 %v537_v15, %v687_v29 }
 0x275   :  { %v700_v32 = vmul.f32 1.442695, %v695_v31 }
 0x276   :  { %v690_v35 = vpop.xlane.xlu1 %689 }
 0x277   :  { %1161 = vpow2.f32 %v700_v32  ;;  %v696_v36 = vsub.f32 %v607_v17, %v690_v35 }
 0x279   :  { %v702_v26 = vmul.f32 1.442695, %v696_v36 }
 0x27a   :  { %v693_v37 = vpop.xlane.xlu1 %692 }
 0x27b   :  { %1163 = vpow2.f32 %v702_v26  ;;  %v697_v38 = vsub.f32 %v677_v21, %v693_v37 }
 0x27d   :  { %v704_v40 = vmul.f32 1.442695, %v697_v38 }
 0x27f   :  { %1165 = vpow2.f32 %v704_v40 }
 0x280   :  { %v1160_v41 = vpop.eup %1159 }
 0x281   :  { %v706_v42 = vsel %vm681_vm2, %v1160_v41, 0.0 }
 0x282   :  { %707 = vadd.xlane.f32.xlu0 %v706_v42 }
 0x284   :  { %v1162_v44 = vpop.eup %1161 }
 0x285   :  { %v709_v45 = vsel %vm681_vm2, %v1162_v44, 0.0 }
 0x286   :  { %710 = vadd.xlane.f32.xlu1 %v709_v45 }
 0x288   :  { %v1164_v46 = vpop.eup %1163 }
 0x289   :  { %v712_v47 = vsel %vm681_vm2, %v1164_v46, 0.0 }
 0x28a   :  { %713 = vadd.xlane.f32.xlu0 %v712_v47 }
 0x28c   :  { %v1166_v50 = vpop.eup %1165 }
 0x28d   :  { %v715_v51 = vsel %vm681_vm2, %v1166_v50, 0.0 }
 0x28e   :  { %716 = vadd.xlane.f32.xlu1 %v715_v51 }
 0x30b   :  { %v708_v52 = vpop.xlane.xlu0 %707 }
 0x30c   :  { %1167 = vrcp.f32 %v708_v52 }
 0x30f   :  { %v711_v53 = vpop.xlane.xlu1 %710 }
 0x310   :  { %1169 = vrcp.f32 %v711_v53 }
 0x313   :  { %v714_v54 = vpop.xlane.xlu0 %713 }
 0x314   :  { %1171 = vrcp.f32 %v714_v54 }
 0x317   :  { %v717_v55 = vpop.xlane.xlu1 %716 }
 0x318   :  { %1173 = vrcp.f32 %v717_v55 }
 0x319   :  { %v1168_v56 = vpop.eup %1167 }
 0x31a   :  { %v722_v57 = vmul.f32 %v1168_v56, %v1160_v41 }
 0x31c   :  { %1115 = vmatmul.mubr.msk.f32.vlgmr.msra.gmra.mxu0 %vm681_vm2, %v722_v57 }
 0x31d   :  { %v1170_v59 = vpop.eup %1169  ;;  %1123 = vmatpush3.msra.mxu0 %v1409_v6  ;;  %1124 = vmatprep.mubr.msk.f32.mxu0 %vm1292_vm1, %v1291_v0 }
 0x31e   :  { %v723_v61 = vmul.f32 %v1170_v59, %v1162_v44 }
 0x320   :  { %1120 = vmatmul.mubr.msk.f32.vlgmr.msra.gmra.mxu1 %vm681_vm2, %v723_v61 }
 0x321   :  { %v1172_v63 = vpop.eup %1171  ;;  %1128 = vmatpush3.msra.mxu1 %v315_v62  ;;  %1129 = vmatprep.mubr.msk.f32.mxu1 %vm1292_vm1, %v1291_v0 }
 0x322   :  { %v724_v1 = vmul.f32 %v1172_v63, %v1164_v46 }
 0x324   :  { %1125 = vmatmul.mubr.msk.f32.vlgmr.msra.gmra.mxu0 %vm681_vm2, %v724_v1 }
 0x325   :  { %v1174_v2 = vpop.eup %1173 }
 0x326   :  { %v725_v3 = vmul.f32 %v1174_v2, %v1166_v50 }
 0x328   :  { %1130 = vmatmul.mubr.msk.f32.vlgmr.msra.gmra.mxu1 %vm681_vm2, %v725_v3 }
 0x3dc   :  { %v795_v6 = vpop.f32.mrf.mxu0 }
 0x3dd   :  { %1018 = vst.msk [vmem:[#allocation10] sm:$0xff] %vm98_vm0, %v795_v6 }
 0x3de   :  { %v1116_v4 = vpop.f32.mrf.mxu0 }
 0x3e0   :  { %v868_v5 = vpop.f32.mrf.mxu1 }
 0x3e1   :  { %1019 = vst.msk [vmem:[#allocation10 + $0x8] sm:$0xff] %vm98_vm0, %v868_v5 }
 0x3e2   :  { %v1121_v58 = vpop.f32.mrf.mxu1 }
 0x3e4   :  { %v941_v7 = vpop.f32.mrf.mxu0 }
 0x3e5   :  { %1020 = vst.msk [vmem:[#allocation10 + $0x10] sm:$0xff] %vm98_vm0, %v941_v7 }
 0x3e6   :  { %v1126_v0 = vpop.f32.mrf.mxu0 }
 0x3e8   :  { %v1014_v8 = vpop.f32.mrf.mxu1 }
 0x3e9   :  { %1021 = vst.msk [vmem:[#allocation10 + $0x18] sm:$0xff] %vm98_vm0, %v1014_v8 }
 0x3ea   :  { %v1131_v9 = vpop.f32.mrf.mxu1 }
 0x3eb   :  { %1266 = shalt.err (!%p1263_p10)
}
 0x3ec   :  { %1033 = dma.vmem_to_hbm [thread:$0]  %s1028_s5, 512, %s1475_s6, [#allocation4], %s1285_s26, %s1285_s26, %s1286_s27  }
 0x3ed   :  { %1281 = dma.done.wait [#allocation4], 512  }
 0x3ee   :  { %1282 = vsyncadd [#allocation4], 4294966784 }
 0x3ef   :  { %1037 = vsyncpa [#allocation3], 1 }
 0x3f0   :  { %1038 = vsyncpa [#allocation6], 1 }
 0x3f1   :  { %1039 = vsyncpa [#allocation9], 1 }
 0x3f2   :  { %1040 = vsyncpa [#allocation4], 1 }

// kernel: tpu_custom_call.1
= control target key start
LH: loop header
LB: loop body
LE: loop exit
PB: predicated region body
PF: predicated region fallthrough
CT: control target
= control target key end

     0   :  { %11 = vsyncpa [#allocation3], 0  ;;  %s1469_s0 = inlined_call_operand.hbm [shape: f32[4,8,32], index: 0, kind: input, shape index: {}]   ;;  %s1470_s1 = inlined_call_operand.hbm [shape: f32[4,8,32], index: 1, kind: input, shape index: {}]   ;;  %s1471_s2 = inlined_call_operand.hbm [shape: f32[32,128], index: 2, kind: input, shape index: {}]   ;;  %s1472_s3 = inlined_call_operand.vmem [shape: f32[1,128], index: 3, kind: input, shape index: {}]   ;;  %s1473_s4 = inlined_call_operand.hbm [shape: f32[32,160], index: 4, kind: input, shape index: {}]   ;;  %s1474_s5 = inlined_call_operand.vmem [shape: f32[1,160], index: 5, kind: input, shape index: {}]   ;;  %s1475_s6 = inlined_call_operand.hbm [shape: f32[4,8,32], index: 6, kind: output, shape index: {}]  }
   0x1   :  { %12 = vsyncpa [#allocation6], 0 }
   0x2   :  { %13 = vsyncpa [#allocation9], 0 }
   0x3   :  { %14 = vsyncpa [#allocation4], 0  ;;  %s1283_s21 = smov [#allocation5]   ;;  %s1284_s23 = smov [#allocation2]  }
   0x4   :  { %s32_s22 = sshll.u32 %s1283_s21, 4  ;;  %s20_s24 = sshll.u32 %s1284_s23, 4  ;;  %s33_s22 = int_to_ptr.vmem [resolvable:$true] %s32_s22  ;;  %s21_s24 = int_to_ptr.vmem [resolvable:$true] %s20_s24 }
   0x5   :  { %s1183_s25 = scalar_lea.vmem %s33_s22, 512  ;;  %p1188_p1 = scmp.lt.s32.totalorder %s33_s22, %s33_s22 }
   0x6   :  { %p1184_p0 = scmp.ne.s32.totalorder %s33_s22, %s1183_s25  ;;  %p1189_p2 = scmp.lt.s32.totalorder %s1183_s25, %s1183_s25 }
   0x8   :  { %p1190_p3 = por %p1189_p2, %p1188_p1 }
   0xa   :  { %p1191_p4 = pnand %p1190_p3, %p1184_p0 }
   0xc   :  { %1194 = shalt.err (!%p1191_p4)
}
   0xd   :  { %s1285_s26 = smov 128   ;;  %s1286_s27 = smov 8  }
   0xe   :  { %38 = dma.hbm_to_vmem [thread:$0]  %s1470_s1, 512, %s33_s22, [#allocation6], %s1285_s26, %s1285_s26, %s1286_s27  }
   0xf   :  { %s1203_s30 = scalar_lea.vmem %s21_s24, 512  ;;  %p1208_p6 = scmp.lt.s32.totalorder %s21_s24, %s21_s24 }
  0x10   :  { %p1204_p5 = scmp.ne.s32.totalorder %s21_s24, %s1203_s30  ;;  %p1209_p7 = scmp.lt.s32.totalorder %s1203_s30, %s1203_s30 }
  0x12   :  { %p1210_p8 = por %p1209_p7, %p1208_p6 }
  0x14   :  { %p1211_p9 = pnand %p1210_p8, %p1204_p5 }
  0x16   :  { %1214 = shalt.err (!%p1211_p9)
}
  0x17   :  { %26 = dma.hbm_to_vmem [thread:$0]  %s1469_s0, 512, %s21_s24, [#allocation3], %s1285_s26, %s1285_s26, %s1286_s27  }
  0x18   :  { %s1287_s9 = smov [#allocation7]   ;;  %s1288_s11 = smov [#allocation8]  }
  0x19   :  { %s44_s10 = sshll.u32 %s1287_s9, 4  ;;  %s58_s12 = sshll.u32 %s1288_s11, 4  ;;  %s45_s10 = int_to_ptr.vmem [resolvable:$true] %s44_s10  ;;  %s59_s12 = int_to_ptr.vmem [resolvable:$true] %s58_s12 }
  0x1a   :  { %s1223_s1 = scalar_lea.vmem %s45_s10, 512  ;;  %p1228_p11 = scmp.lt.s32.totalorder %s45_s10, %s45_s10 }
  0x1b   :  { %p1224_p10 = scmp.ne.s32.totalorder %s45_s10, %s1223_s1  ;;  %p1229_p12 = scmp.lt.s32.totalorder %s1223_s1, %s1223_s1 }
  0x1d   :  { %p1230_p13 = por %p1229_p12, %p1228_p11 }
  0x1f   :  { %p1231_p0 = pnand %p1230_p13, %p1224_p10 }
  0x21   :  { %1234 = shalt.err (!%p1231_p0)
}
  0x22   :  { %50 = dma.hbm_to_vmem [thread:$0]  %s1471_s2, 512, %s45_s10, [#allocation6], %s1285_s26, %s1285_s26, %s1286_s27  }
  0x23   :  { %s1243_s0 = scalar_lea.vmem %s59_s12, 1024  ;;  %p1248_p2 = scmp.lt.s32.totalorder %s59_s12, %s59_s12 }
  0x24   :  { %p1244_p1 = scmp.ne.s32.totalorder %s59_s12, %s1243_s0  ;;  %p1249_p3 = scmp.lt.s32.totalorder %s1243_s0, %s1243_s0 }
  0x26   :  { %p1250_p4 = por %p1249_p3, %p1248_p2 }
  0x28   :  { %p1251_p5 = pnand %p1250_p4, %p1244_p1 }
  0x2a   :  { %1254 = shalt.err (!%p1251_p5)
}
  0x2b   :  { %s1289_s15 = smov 256   ;;  %s1290_s16 = smov 16  }
  0x2c   :  { %64 = dma.hbm_to_vmem [thread:$0]  %s1473_s4, 1024, %s59_s12, [#allocation9], %s1289_s15, %s1289_s15, %s1290_s16  }
  0x2d   :  { %1275 = dma.done.wait [#allocation3], 512  }
  0x2e   :  { %1276 = vsyncadd [#allocation3], 4294966784 }
  0x2f   :  { %1277 = dma.done.wait [#allocation6], 1024  }
  0x30   :  { %1278 = vsyncadd [#allocation6], 4294966272 }
  0x31   :  { %1279 = dma.done.wait [#allocation9], 1024  }
  0x32   :  { %1280 = vsyncadd [#allocation9], 4294966272  ;;  %v1291_v0 = vmov 0.0   ;;  %v90_v1 = vld [vmem:[#allocation7 + $0x18] sm:$0xff]  ;;  %v202_v3 = vld [vmem:[#allocation8 + $0x30] sm:$0xff]  ;;  %vm98_vm0 = vcmask 261120   ;;  %v206_v21 = vlaneseq }
  0x33   :  { %292 = vmatprep.mubr.f32.mxu1 %v1291_v0  ;;  %v203_v2 = vld [vmem:[#allocation8 + $0x38] sm:$0xff]  ;;  %1078 = vmatprep.subr.mxu0 %v90_v1  ;;  %v89_v4 = vld [vmem:[#allocation7 + $0x10] sm:$0xff]  ;;  %v201_v5 = vld [vmem:[#allocation8 + $0x28] sm:$0xff]  ;;  %vm1292_vm1 = vmmov 0   ;;  %vm681_vm2 = vcmask 64512  }
  0x34   :  { %252 = vmatprep.subr.mxu1 %v203_v2  ;;  %v200_v6 = vld [vmem:[#allocation8 + $0x20] sm:$0xff]  ;;  %1079 = vmatpush3.msra.mxu0 %v90_v1  ;;  %v88_v7 = vld [vmem:[#allocation7 + $0x8] sm:$0xff]  ;;  %v199_v8 = vld [vmem:[#allocation8 + $0x18] sm:$0xff]  ;;  %v207_v22 = vshrl.u32 %v206_v21, 7 }
  0x35   :  { %253 = vmatpush1.msra.mxu1 %v202_v3  ;;  %1080 = vmatprep.subr.mxu0 %v89_v4  ;;  %v198_v9 = vld [vmem:[#allocation8 + $0x10] sm:$0xff]  ;;  %v87_v10 = vld [vmem:[#allocation7] sm:$0xff]  ;;  %v197_v11 = vld [vmem:[#allocation8 + $0x8] sm:$0xff] }
  0x36   :  { %254 = vmatprep.subr.mxu1 %v201_v5  ;;  %1081 = vmatpush3.msra.mxu0 %v89_v4  ;;  %v79_v12 = vld [vmem:[#allocation2] sm:$0xff]  ;;  %v80_v14 = vld [vmem:[#allocation2 + $0x8] sm:$0xff]  ;;  %v81_v16 = vld [vmem:[#allocation2 + $0x10] sm:$0xff]  ;;  %v208_v23 = vsub.s32 0, %v207_v22  ;;  %v212_v42 = vsub.s32 1, %v207_v22 }
  0x37   :  { %255 = vmatpush1.msra.mxu1 %v200_v6  ;;  %1082 = vmatprep.subr.mxu0 %v88_v7  ;;  %v196_v13 = vld [vmem:[#allocation8] sm:$0xff]  ;;  %v82_v17 = vld [vmem:[#allocation2 + $0x18] sm:$0xff]  ;;  %v84_v18 = vld [vmem:[#allocation5 + $0x8] sm:$0xff] }
  0x38   :  { %256 = vmatprep.subr.mxu1 %v199_v8  ;;  %1083 = vmatpush3.msra.mxu0 %v88_v7  ;;  %v83_v15 = vld [vmem:[#allocation5] sm:$0xff]  ;;  %v85_v19 = vld [vmem:[#allocation5 + $0x10] sm:$0xff]  ;;  %v86_v20 = vld [vmem:[#allocation5 + $0x18] sm:$0xff] }
  0x39   :  { %257 = vmatpush1.msra.mxu1 %v198_v9  ;;  %1084 = vmatprep.subr.mxu0 %v87_v10  ;;  %v204_v24 = vld [vmem:[%s1474_s5] sm:$0x3] }
  0x3a   :  { %258 = vmatprep.subr.mxu1 %v197_v11  ;;  %1085 = vmatpush3.msra.mxu0 %v87_v10  ;;  %v1041_v25 = vld [vmem:[%s1472_s3] ss:$0 sm:$0xff]  ;;  %v209_v26 = vrot.slane %v204_v24, %v208_v23  ;;  %v1402_v58 = vrot.slane %v204_v24, %v212_v42  ;;  %s1293_s3 = smov [#allocation10]  }
  0x3b   :  { %1086 = vmatprep.mubr.msk.f32.mxu0 %vm98_vm0, %v79_v12  ;;  %259 = vmatpush1.msra.mxu1 %v196_v13  ;;  %s1027_s5 = sshll.u32 %s1293_s3, 4  ;;  %s1028_s5 = int_to_ptr.vmem [resolvable:$true] %s1027_s5 }
  0x3c   :  { %1087 = vmatmul.mubr.msk.f32.vlgmr.msra.gmra.mxu0 %vm98_vm0, %v80_v14  ;;  %1046 = vmatmul.mubr.msk.f32.vlgmr.msra.gmra.mxu1 %vm98_vm0, %v83_v15  ;;  %s1255_s21 = scalar_lea.vmem %s1028_s5, 512  ;;  %p1260_p7 = scmp.lt.s32.totalorder %s1028_s5, %s1028_s5 }
  0x3d   :  { %1089 = vmatprep.mubr.msk.f32.mxu0 %vm98_vm0, %v81_v16  ;;  %298 = vmatprep.mubr.f32.mxu1 %v1291_v0  ;;  %p1256_p6 = scmp.ne.s32.totalorder %s1028_s5, %s1255_s21  ;;  %p1261_p8 = scmp.lt.s32.totalorder %s1255_s21, %s1255_s21 }
  0x3e   :  { %1092 = vmatprep.subr.mxu0 %v1291_v0  ;;  %1107 = vmatprep.subr.mxu1 %v1291_v0 }
  0x3f   :  { %p1262_p9 = por %p1261_p8, %p1260_p7 }
  0x40   :  { %1090 = vmatmul.mubr.msk.f32.gmra.mxu0 %vm98_vm0, %v82_v17  ;;  %1047 = vmatmul.mubr.msk.f32.gmra.mxu1 %vm98_vm0, %v84_v18 }
  0x41   :  { %304 = vmatprep.mubr.f32.mxu1 %v1291_v0  ;;  %1094 = vmatprep.mubr.msk.f32.mxu0 %vm1292_vm1, %v1291_v0  ;;  %p1263_p10 = pnand %p1262_p9, %p1256_p6 }
  0x44   :  { %1048 = vmatmul.mubr.msk.f32.gmra.mxu1 %vm98_vm0, %v85_v19 }
  0x45   :  { %310 = vmatprep.mubr.f32.mxu1 %v1291_v0 }
  0x48   :  { %1049 = vmatmul.mubr.msk.f32.gmra.mxu1 %vm98_vm0, %v86_v20 }
  0x49   :  { %1109 = vmatprep.mubr.msk.f32.mxu1 %vm1292_vm1, %v1291_v0 }
  0xfc   :  { %v1088_v27 = vpop.f32.mrf.mxu0  ;;  %v294_v29 = vpop.f32.mrf.mxu1 }
  0xfd   :  { %v1374_v28 = vadd.f32 %v1088_v27, %v1041_v25  ;;  %v1376_v30 = vadd.f32 %v294_v29, %v209_v26 }
  0xfe   :  { %v177_v31 = vpop.f32.mrf.mxu0  ;;  %v1382_v34 = vpop.f32.mrf.mxu1 }
  0xff   :  { %v318_v32 = vmul.f32 %v1374_v28, %v1374_v28  ;;  %v1380_v33 = vadd.f32 %v1041_v25, %v177_v31  ;;  %v361_v35 = vmul.f32 %v1376_v30, %v1376_v30 }
 0x100   :  { %v1091_v36 = vpop.f32.mrf.mxu0  ;;  %v300_v40 = vpop.f32.mrf.mxu1 }
 0x101   :  { %v327_v37 = vrot.slane %v318_v32, 4  ;;  %v317_v38 = vmul.f32 %v1380_v33, %v1380_v33  ;;  %v1388_v39 = vadd.f32 %v1091_v36, %v1041_v25  ;;  %v365_v41 = vrot.slane %v361_v35, 4 }
 0x102   :  { %v1390_v43 = vadd.f32 %v300_v40, %v209_v26  ;;  %v187_v44 = vpop.f32.mrf.mxu0  ;;  %v1396_v49 = vpop.f32.mrf.mxu1 }
 0x103   :  { %v328_v45 = vadd.f32 %v327_v37, %v318_v32  ;;  %v321_v46 = vrot.slane %v317_v38, 4  ;;  %v320_v47 = vmul.f32 %v1388_v39, %v1388_v39  ;;  %v1394_v48 = vadd.f32 %v1041_v25, %v187_v44 }
 0x104   :  { %v366_v50 = vadd.f32 %v365_v41, %v361_v35  ;;  %v362_v51 = vmul.f32 %v1390_v43, %v1390_v43  ;;  %v306_v56 = vpop.f32.mrf.mxu1 }
 0x105   :  { %v329_v52 = vrot.slane %v328_v45, 2  ;;  %v322_v53 = vadd.f32 %v321_v46, %v317_v38  ;;  %v339_v54 = vrot.slane %v320_v47, 4  ;;  %v319_v55 = vmul.f32 %v1394_v48, %v1394_v48 }
 0x106   :  { %v367_v57 = vrot.slane %v366_v50, 2  ;;  %v371_v59 = vrot.slane %v362_v51, 4  ;;  %v1404_v60 = vadd.f32 %v306_v56, %v209_v26  ;;  %v308_v2 = vpop.f32.mrf.mxu1 }
 0x107   :  { %v330_v61 = vadd.f32 %v329_v52, %v328_v45  ;;  %v323_v62 = vrot.slane %v322_v53, 2  ;;  %v340_v63 = vadd.f32 %v339_v54, %v320_v47  ;;  %v333_v1 = vrot.slane %v319_v55, 4 }
 0x108   :  { %v368_v3 = vadd.f32 %v367_v57, %v366_v50  ;;  %v372_v4 = vadd.f32 %v371_v59, %v362_v51  ;;  %v363_v5 = vmul.f32 %v1404_v60, %v1404_v60  ;;  %v1409_v6 = vadd.f32 %v308_v2, %v1402_v58  ;;  %v312_v11 = vpop.f32.mrf.mxu1 }
 0x109   :  { %v331_v7 = vrot.slane %v330_v61, 1  ;;  %v324_v8 = vadd.f32 %v323_v62, %v322_v53  ;;  %v341_v9 = vrot.slane %v340_v63, 2  ;;  %v334_v10 = vadd.f32 %v333_v1, %v319_v55 }
 0x10a   :  { %v369_v12 = vrot.slane %v368_v3, 1  ;;  %v373_v13 = vrot.slane %v372_v4, 2  ;;  %v377_v14 = vrot.slane %v363_v5, 4  ;;  %v1411_v15 = vadd.f32 %v312_v11, %v209_v26 }
 0x10b   :  { %v332_v16 = vadd.f32 %v331_v7, %v330_v61  ;;  %v325_v17 = vrot.slane %v324_v8, 1  ;;  %v342_v18 = vadd.f32 %v341_v9, %v340_v63  ;;  %v335_v19 = vrot.slane %v334_v10, 2 }
 0x10c   :  { %v370_v20 = vadd.f32 %v369_v12, %v368_v3  ;;  %v374_v21 = vadd.f32 %v373_v13, %v372_v4  ;;  %v378_v22 = vadd.f32 %v377_v14, %v363_v5  ;;  %v364_v23 = vmul.f32 %v1411_v15, %v1411_v15 }
 0x10d   :  { %v346_v24 = vmax.f32 %v332_v16, 1e-24  ;;  %v326_v25 = vadd.f32 %v325_v17, %v324_v8  ;;  %v343_v27 = vrot.slane %v342_v18, 1  ;;  %v336_v29 = vadd.f32 %v335_v19, %v334_v10  ;;  %v314_v19 = vpop.f32.mrf.mxu1 }
 0x10e   :  { %v389_v31 = vmax.f32 %v370_v20, 1e-24  ;;  %v375_v32 = vrot.slane %v374_v21, 1  ;;  %v379_v35 = vrot.slane %v378_v22, 2  ;;  %v383_v36 = vrot.slane %v364_v23, 4 }
 0x10f   :  { %1143 = vrsqrt.f32 %v346_v24  ;;  %v345_v26 = vmax.f32 %v326_v25, 1e-24  ;;  %v337_v37 = vrot.slane %v336_v29, 1  ;;  %v344_v42 = vadd.f32 %v343_v27, %v342_v18 }
 0x110   :  { %1145 = vrsqrt.f32 %v389_v31  ;;  %v376_v38 = vadd.f32 %v375_v32, %v374_v21  ;;  %v380_v40 = vadd.f32 %v379_v35, %v378_v22  ;;  %v384_v41 = vadd.f32 %v383_v36, %v364_v23 }
 0x111   :  { %1147 = vrsqrt.f32 %v345_v26  ;;  %v338_v44 = vadd.f32 %v337_v37, %v336_v29  ;;  %v348_v53 = vmax.f32 %v344_v42, 1e-24 }
 0x112   :  { %v390_v45 = vmax.f32 %v376_v38, 1e-24  ;;  %v381_v46 = vrot.slane %v380_v40, 1  ;;  %v385_v47 = vrot.slane %v384_v41, 2 }
 0x113   :  { %v347_v50 = vmax.f32 %v338_v44, 1e-24 }
 0x114   :  { %1149 = vrsqrt.f32 %v390_v45  ;;  %v382_v51 = vadd.f32 %v381_v46, %v380_v40  ;;  %v386_v52 = vadd.f32 %v385_v47, %v384_v41 }
 0x115   :  { %1151 = vrsqrt.f32 %v347_v50 }
 0x116   :  { %v391_v54 = vmax.f32 %v382_v51, 1e-24  ;;  %v387_v55 = vrot.slane %v386_v52, 1 }
 0x118   :  { %1153 = vrsqrt.f32 %v391_v54  ;;  %v388_v56 = vadd.f32 %v387_v55, %v386_v52 }
 0x119   :  { %1155 = vrsqrt.f32 %v348_v53 }
 0x11a   :  { %v392_v57 = vmax.f32 %v388_v56, 1e-24 }
 0x11c   :  { %v1144_v59 = vpop.eup %1143  ;;  %1157 = vrsqrt.f32 %v392_v57 }
 0x11d   :  { %v1146_v61 = vpop.eup %1145  ;;  %v354_v3 = vmul.f32 0.25, %v1144_v59 }
 0x11e   :  { %v1148_v62 = vpop.eup %1147  ;;  %v397_v63 = vmul.f32 %v1146_v61, %v1376_v30 }
 0x11f   :  { %v353_v1 = vmul.f32 0.25, %v1148_v62  ;;  %v358_v9 = vmul.f32 %v354_v3, %v1374_v28  ;;  %v297_v28 = vadd.f32 %v1382_v34, %v1402_v58  ;;  %v315_v62 = vadd.f32 %v314_v19, %v1402_v58 }
 0x120   :  { %1093 = vmatpush3.xpose.msra.mxu0 %v397_v63 }
 0x121   :  { %v1150_v2 = vpop.eup %1149  ;;  %v357_v4 = vmul.f32 %v353_v1, %v1380_v33  ;;  %1097 = vmatprep.subr.mxu0 %v1291_v0 }
 0x122   :  { %v1152_v5 = vpop.eup %1151  ;;  %v398_v7 = vmul.f32 %v1150_v2, %v1390_v43 }
 0x123   :  { %1095 = vmatmul.mubr.f32.vlgmr.msra.gmra.mxu0 %v357_v4  ;;  %v355_v30 = vmul.f32 0.25, %v1152_v5 }
 0x124   :  { %1098 = vmatpush3.xpose.msra.mxu0 %v398_v7  ;;  %1099 = vmatprep.mubr.msk.f32.mxu0 %vm1292_vm1, %v1291_v0 }
 0x125   :  { %v1154_v8 = vpop.eup %1153  ;;  %1102 = vmatprep.subr.mxu0 %v1291_v0  ;;  %v359_v12 = vmul.f32 %v355_v30, %v1394_v48  ;;  %v303_v48 = vadd.f32 %v1396_v49, %v1402_v58 }
 0x126   :  { %v1156_v10 = vpop.eup %1155  ;;  %v399_v11 = vmul.f32 %v1154_v8, %v1404_v60 }
 0x127   :  { %1100 = vmatmul.mubr.f32.vlgmr.msra.gmra.mxu0 %v358_v9  ;;  %v356_v43 = vmul.f32 0.25, %v1156_v10 }
 0x128   :  { %1103 = vmatpush3.xpose.msra.mxu0 %v399_v11  ;;  %1104 = vmatprep.mubr.msk.f32.mxu0 %vm1292_vm1, %v1291_v0 }
 0x129   :  { %v1158_v33 = vpop.eup %1157  ;;  %1112 = vmatprep.subr.mxu0 %v1291_v0  ;;  %v360_v60 = vmul.f32 %v356_v43, %v1388_v39 }
 0x12a   :  { %v400_v13 = vmul.f32 %v1158_v33, %v1411_v15 }
 0x12b   :  { %1105 = vmatmul.mubr.f32.vlgmr.msra.gmra.mxu0 %v359_v12 }
 0x12c   :  { %1108 = vmatpush3.xpose.msra.mxu1 %v400_v13  ;;  %1113 = vmatpush3.msra.mxu0 %v297_v28 }
 0x12d   :  { %1117 = vmatprep.subr.mxu1 %v1291_v0  ;;  %1114 = vmatprep.mubr.msk.f32.mxu0 %vm1292_vm1, %v1291_v0 }
 0x12e   :  { %1122 = vmatprep.subr.mxu0 %v1291_v0 }
 0x12f   :  { %1110 = vmatmul.mubr.f32.vlgmr.msra.gmra.mxu1 %v360_v60 }
 0x130   :  { %1118 = vmatpush3.msra.mxu1 %v303_v48  ;;  %1119 = vmatprep.mubr.msk.f32.mxu1 %vm1292_vm1, %v1291_v0 }
 0x131   :  { %1127 = vmatprep.subr.mxu1 %v1291_v0 }
 0x1e3   :  { %v467_v34 = vpop.f32.mrf.mxu0 }
 0x1e4   :  { %v682_v39 = vsel %vm681_vm2, %v467_v34, -inf }
 0x1e5   :  { %683 = vmax.xlane.f32.xlu0 %v682_v39  ;;  %v1096_v14 = vpop.f32.mrf.mxu0 }
 0x1e7   :  { %v537_v15 = vpop.f32.mrf.mxu0 }
 0x1e8   :  { %v685_v16 = vsel %vm681_vm2, %v537_v15, -inf }
 0x1e9   :  { %686 = vmax.xlane.f32.xlu0 %v685_v16  ;;  %v1101_v49 = vpop.f32.mrf.mxu0 }
 0x1eb   :  { %v607_v17 = vpop.f32.mrf.mxu0 }
 0x1ec   :  { %v688_v18 = vsel %vm681_vm2, %v607_v17, -inf }
 0x1ed   :  { %689 = vmax.xlane.f32.xlu1 %v688_v18  ;;  %v1106_v20 = vpop.f32.mrf.mxu0 }
 0x1ef   :  { %v677_v21 = vpop.f32.mrf.mxu1 }
 0x1f0   :  { %v691_v22 = vsel %vm681_vm2, %v677_v21, -inf }
 0x1f1   :  { %v1111_v23 = vpop.f32.mrf.mxu1  ;;  %692 = vmax.xlane.f32.xlu1 %v691_v22 }
 0x26e   :  { %v684_v24 = vpop.xlane.xlu0 %683 }
 0x26f   :  { %v694_v25 = vsub.f32 %v467_v34, %v684_v24 }
 0x271   :  { %v698_v27 = vmul.f32 1.442695, %v694_v25 }
 0x272   :  { %v687_v29 = vpop.xlane.xlu0 %686 }
 0x273   :  { %1159 = vpow2.f32 %v698_v27  ;;  %v695_v31 = vsub.f32 %v537_v15, %v687_v29 }
 0x275   :  { %v700_v32 = vmul.f32 1.442695, %v695_v31 }
 0x276   :  { %v690_v35 = vpop.xlane.xlu1 %689 }
 0x277   :  { %1161 = vpow2.f32 %v700_v32  ;;  %v696_v36 = vsub.f32 %v607_v17, %v690_v35 }
 0x279   :  { %v702_v26 = vmul.f32 1.442695, %v696_v36 }
 0x27a   :  { %v693_v37 = vpop.xlane.xlu1 %692 }
 0x27b   :  { %1163 = vpow2.f32 %v702_v26  ;;  %v697_v38 = vsub.f32 %v677_v21, %v693_v37 }
 0x27d   :  { %v704_v40 = vmul.f32 1.442695, %v697_v38 }
 0x27f   :  { %1165 = vpow2.f32 %v704_v40 }
 0x280   :  { %v1160_v41 = vpop.eup %1159 }
 0x281   :  { %v706_v42 = vsel %vm681_vm2, %v1160_v41, 0.0 }
 0x282   :  { %707 = vadd.xlane.f32.xlu0 %v706_v42 }
 0x284   :  { %v1162_v44 = vpop.eup %1161 }
 0x285   :  { %v709_v45 = vsel %vm681_vm2, %v1162_v44, 0.0 }
 0x286   :  { %710 = vadd.xlane.f32.xlu1 %v709_v45 }
 0x288   :  { %v1164_v46 = vpop.eup %1163 }
 0x289   :  { %v712_v47 = vsel %vm681_vm2, %v1164_v46, 0.0 }
 0x28a   :  { %713 = vadd.xlane.f32.xlu0 %v712_v47 }
 0x28c   :  { %v1166_v50 = vpop.eup %1165 }
 0x28d   :  { %v715_v51 = vsel %vm681_vm2, %v1166_v50, 0.0 }
 0x28e   :  { %716 = vadd.xlane.f32.xlu1 %v715_v51 }
 0x30b   :  { %v708_v52 = vpop.xlane.xlu0 %707 }
 0x30c   :  { %1167 = vrcp.f32 %v708_v52 }
 0x30f   :  { %v711_v53 = vpop.xlane.xlu1 %710 }
 0x310   :  { %1169 = vrcp.f32 %v711_v53 }
 0x313   :  { %v714_v54 = vpop.xlane.xlu0 %713 }
 0x314   :  { %1171 = vrcp.f32 %v714_v54 }
 0x317   :  { %v717_v55 = vpop.xlane.xlu1 %716 }
 0x318   :  { %1173 = vrcp.f32 %v717_v55 }
 0x319   :  { %v1168_v56 = vpop.eup %1167 }
 0x31a   :  { %v722_v57 = vmul.f32 %v1168_v56, %v1160_v41 }
 0x31c   :  { %1115 = vmatmul.mubr.msk.f32.vlgmr.msra.gmra.mxu0 %vm681_vm2, %v722_v57 }
 0x31d   :  { %v1170_v59 = vpop.eup %1169  ;;  %1123 = vmatpush3.msra.mxu0 %v1409_v6  ;;  %1124 = vmatprep.mubr.msk.f32.mxu0 %vm1292_vm1, %v1291_v0 }
 0x31e   :  { %v723_v61 = vmul.f32 %v1170_v59, %v1162_v44 }
 0x320   :  { %1120 = vmatmul.mubr.msk.f32.vlgmr.msra.gmra.mxu1 %vm681_vm2, %v723_v61 }
 0x321   :  { %v1172_v63 = vpop.eup %1171  ;;  %1128 = vmatpush3.msra.mxu1 %v315_v62  ;;  %1129 = vmatprep.mubr.msk.f32.mxu1 %vm1292_vm1, %v1291_v0 }
 0x322   :  { %v724_v1 = vmul.f32 %v1172_v63, %v1164_v46 }
 0x324   :  { %1125 = vmatmul.mubr.msk.f32.vlgmr.msra.gmra.mxu0 %vm681_vm2, %v724_v1 }
 0x325   :  { %v1174_v2 = vpop.eup %1173 }
 0x326   :  { %v725_v3 = vmul.f32 %v1174_v2, %v1166_v50 }
 0x328   :  { %1130 = vmatmul.mubr.msk.f32.vlgmr.msra.gmra.mxu1 %vm681_vm2, %v725_v3 }
 0x3dc   :  { %v795_v6 = vpop.f32.mrf.mxu0 }
 0x3dd   :  { %1018 = vst.msk [vmem:[#allocation10] sm:$0xff] %vm98_vm0, %v795_v6 }
 0x3de   :  { %v1116_v4 = vpop.f32.mrf.mxu0 }
 0x3e0   :  { %v868_v5 = vpop.f32.mrf.mxu1 }
 0x3e1   :  { %1019 = vst.msk [vmem:[#allocation10 + $0x8] sm:$0xff] %vm98_vm0, %v868_v5 }
 0x3e2   :  { %v1121_v58 = vpop.f32.mrf.mxu1 }
 0x3e4   :  { %v941_v7 = vpop.f32.mrf.mxu0 }
 0x3e5   :  { %1020 = vst.msk [vmem:[#allocation10 + $0x10] sm:$0xff] %vm98_vm0, %v941_v7 }
 0x3e6   :  { %v1126_v0 = vpop.f32.mrf.mxu0 }
 0x3e8   :  { %v1014_v8 = vpop.f32.mrf.mxu1 }
 0x3e9   :  { %1021 = vst.msk [vmem:[#allocation10 + $0x18] sm:$0xff] %vm98_vm0, %v1014_v8 }
 0x3ea   :  { %v1131_v9 = vpop.f32.mrf.mxu1 }
 0x3eb   :  { %1266 = shalt.err (!%p1263_p10)
}
 0x3ec   :  { %1033 = dma.vmem_to_hbm [thread:$0]  %s1028_s5, 512, %s1475_s6, [#allocation4], %s1285_s26, %s1285_s26, %s1286_s27  }
 0x3ed   :  { %1281 = dma.done.wait [#allocation4], 512  }
 0x3ee   :  { %1282 = vsyncadd [#allocation4], 4294966784 }
 0x3ef   :  { %1037 = vsyncpa [#allocation3], 1 }
 0x3f0   :  { %1038 = vsyncpa [#allocation6], 1 }
 0x3f1   :  { %1039 = vsyncpa [#allocation9], 1 }
 0x3f2   :  { %1040 = vsyncpa [#allocation4], 1 }

</bundles_post_ra>
